<compile_context>
chip_gen: v5e
topology: v5e:2x2
jax: 0.10.0
libtpu: 0.0.40
codegen_flags: <defaults>
</compile_context>

<pallas_src>
import functools

import numpy as np
import jax
import jax.numpy as jnp
from jax.experimental import pallas as pl
from jax.experimental.pallas import tpu as pltpu

_SQRT2 = float(np.sqrt(2.0))


def _gelu(x):
    # Exact (erf-based) GELU, matching torch.nn.GELU() default (approximate='none').
    return 0.5 * x * (1.0 + jax.lax.erf(x / _SQRT2))


def _dot(a, b):
    return jnp.dot(a, b, preferred_element_type=jnp.float32)


def pffn_kernel(x_ref, wa_ref, ba_ref, w1_ref, b1_ref, w2_ref, b2_ref,
                w3_ref, b3_ref, wb1_ref, wb2_ref, bb_ref, kf_ref, ki_ref,
                o_ref):
    C = w1_ref.shape[0]
    HW = x_ref.shape[2]
    x = x_ref[0]                                               # (C, HW) f32

    # conva (1x1 -> 2C) + GELU as ONE fused matmul; the channel split is a row slice.
    h = _gelu(_dot(wa_ref[...], x) + ba_ref[...])              # (2C, HW)

    # branch 1: conv1 + GELU.
    x1 = _gelu(_dot(w1_ref[...], h[:C]) + b1_ref[...])         # (C, HW)

    # branch 2: forward 2-D FFT as one (HW, 2HW) bf16 matmul -> [Re | Im] lane halves.
    xf = _dot(h[C:].astype(jnp.bfloat16), kf_ref[...])         # (C, 2HW) f32

    # conv2 on the real lane-half, conv3 on the imag lane-half, + GELU.
    yr = _gelu(_dot(w2_ref[...], xf[:, :HW]) + b2_ref[...])    # (C, HW)
    yi = _gelu(_dot(w3_ref[...], xf[:, HW:]) + b3_ref[...])    # (C, HW)
    y = jnp.concatenate([yr, yi], axis=1).astype(jnp.bfloat16)  # (C, 2HW): [Re | Im]

    # inverse 2-D FFT of (yr + i*yi): one (2HW, 2HW) complex-as-real operator
    # giving [zr | zi] directly, then magnitude.
    z = _dot(y, ki_ref[...])                                   # (C, 2HW) f32
    zr, zi = z[:, :HW], z[:, HW:]
    mag = jnp.sqrt(zr * zr + zi * zi)                          # (C, HW)

    # convb(cat([x1, mag], channel)) == Wb[:, :C] @ x1 + Wb[:, C:] @ mag + bb
    o_ref[0] = _dot(wb1_ref[...], x1) + _dot(wb2_ref[...], mag) + bb_ref[...]


def _dft_matrix(n):
    k = np.arange(n)
    return np.exp(-2j * np.pi * np.outer(k, k) / n)


@functools.lru_cache(maxsize=None)
def _dft_operators(h, w):
    """bf16 DFT operators, cached per (H, W).

    Forward: (HW, 2HW) so that  x(C,HW) @ kfs = [Re(FFT(x)) | Im(FFT(x))].
    Inverse: (2HW, 2HW) so that [yr | yi](C,2HW) @ kis = [Re(IFFT(y)) | Im(IFFT(y))].
    """
    kf = np.kron(_dft_matrix(h), _dft_matrix(w))               # (HW, HW) complex, symmetric
    ki = np.conj(kf) / (h * w)
    kfs = np.concatenate([kf.real.T, kf.imag.T], axis=1)       # (HW, 2HW)
    kir, kii = ki.real.T, ki.imag.T
    kis = np.block([[kir, kii], [-kii, kir]])                  # (2HW, 2HW)
    return (jnp.asarray(kfs, jnp.bfloat16), jnp.asarray(kis, jnp.bfloat16))


@jax.jit
def _pffn_pallas(x_nchw, params, kfs, kis):
    wa, ba, w1, b1, w2, b2, w3, b3, wb, bb = params
    N, C, H, W = x_nchw.shape
    HW = H * W
    x = x_nchw.reshape(N, C, HW)          # NCHW is already (C, H*W)-contiguous

    # convb concat folded into weight halves; biases as (C, 1) lane-broadcast columns.
    wb1, wb2 = wb[:, :C], wb[:, C:]
    ba2, b12, b22, b32, bb2 = (ba[:, None], b1[:, None], b2[:, None],
                               b3[:, None], bb[:, None])

    const = lambda arr: pl.BlockSpec(arr.shape, lambda n: (0, 0))

    out = pl.pallas_call(
        pffn_kernel,
        out_shape=jax.ShapeDtypeStruct((N, C, HW), jnp.float32),
        grid=(N,),
        in_specs=[
            pl.BlockSpec((1, C, HW), lambda n: (n, 0, 0)),     # x: one batch elem / step
            const(wa), const(ba2),                             # conva (fused 2C out)
            const(w1), const(b12),                             # conv1
            const(w2), const(b22),                             # conv2 (real half)
            const(w3), const(b32),                             # conv3 (imag half)
            const(wb1), const(wb2), const(bb2),                # convb halves + bias
            const(kfs), const(kis),                            # DFT operators
        ],
        out_specs=pl.BlockSpec((1, C, HW), lambda n: (n, 0, 0)),
        compiler_params=pltpu.CompilerParams(
            dimension_semantics=("parallel",)),                # batch is independent
    )(x, wa, ba2, w1, b12, w2, b22, w3, b32, wb1, wb2, bb2, kfs, kis)

    return out.reshape(N, C, H, W)


def pffn_forward(x_nchw, params):
    """x_nchw: (N, C, H, W) float32; params: 10 conv weights/biases (see __main__)."""
    _, _, H, W = x_nchw.shape
    kfs, kis = _dft_operators(H, W)       # built on host once per (H, W), cached
    return _pffn_pallas(x_nchw, params, kfs, kis)


def pffn_reference(x_nchw, params):
    """Pure-JAX reference matching the PyTorch forward (for validation)."""
    wa, ba, w1, b1, w2, b2, w3, b3, wb, bb = params
    C = w1.shape[0]
    gelu = lambda v: jax.nn.gelu(v, approximate=False)
    conv = lambda v, wm, bv: jnp.einsum('oc,nchw->nohw', wm, v) + bv[None, :, None, None]
    h = gelu(conv(x_nchw, wa, ba))
    x1 = gelu(conv(h[:, :C], w1, b1))
    x2f = jnp.fft.fftn(h[:, C:].astype(jnp.complex64), axes=(2, 3))
    yr = gelu(conv(x2f.real, w2, b2))
    yi = gelu(conv(x2f.imag, w3, b3))
    mag = jnp.abs(jnp.fft.ifftn(yr + 1j * yi, axes=(2, 3)))
    return conv(jnp.concatenate([x1, mag], axis=1), wb, bb)


if __name__ == "__main__":
    N, dim, H, W = 2, 8, 16, 16
    key = jax.random.PRNGKey(0)
    keys = jax.random.split(key, 11)

    def mk(k, shape):
        return jax.random.normal(k, shape, jnp.float32) * 0.1

    # nn.Conv2d 1x1 weights stored as (C_out, C_in) matrices + (C_out,) biases.
    wa, ba = mk(keys[0], (2 * dim, dim)), mk(keys[1], (2 * dim,))   # conva: dim -> 2*dim
    w1, b1 = mk(keys[2], (dim, dim)), mk(keys[3], (dim,))           # conv1
    w2, b2 = mk(keys[4], (dim, dim)), mk(keys[5], (dim,))           # conv2 (real)
    w3, b3 = mk(keys[6], (dim, dim)), mk(keys[7], (dim,))           # conv3 (imag)
    wb, bb = mk(keys[8], (dim, 2 * dim)), mk(keys[9], (dim,))       # convb: 2*dim -> dim
    params = (wa, ba, w1, b1, w2, b2, w3, b3, wb, bb)

    x = jax.random.normal(keys[10], (N, dim, H, W), jnp.float32)

    out = pffn_forward(x, params)
    jax.block_until_ready(out)

    ref = pffn_reference(x, params)
    assert out.shape == (N, dim, H, W)
    err = float(jnp.max(jnp.abs(out - ref)))
    assert err < 5e-3, f"max abs err = {err}"
    print("KERNEL_OK")
</pallas_src>

<mosaic_0001>
module attributes {stable_mosaic.version = 11 : i64} {
  func.func @pffn_kernel(%arg0: i32, %arg1: memref<1x8x256xf32, #tpu.memory_space<vmem>>, %arg2: memref<16x8xf32, #tpu.memory_space<vmem>>, %arg3: memref<16x1xf32, #tpu.memory_space<vmem>>, %arg4: memref<8x8xf32, #tpu.memory_space<vmem>>, %arg5: memref<8x1xf32, #tpu.memory_space<vmem>>, %arg6: memref<8x8xf32, #tpu.memory_space<vmem>>, %arg7: memref<8x1xf32, #tpu.memory_space<vmem>>, %arg8: memref<8x8xf32, #tpu.memory_space<vmem>>, %arg9: memref<8x1xf32, #tpu.memory_space<vmem>>, %arg10: memref<8x8xf32, #tpu.memory_space<vmem>>, %arg11: memref<8x8xf32, #tpu.memory_space<vmem>>, %arg12: memref<8x1xf32, #tpu.memory_space<vmem>>, %arg13: memref<256x512xbf16, #tpu.memory_space<vmem>>, %arg14: memref<512x512xbf16, #tpu.memory_space<vmem>>, %arg15: memref<1x8x256xf32, #tpu.memory_space<vmem>>) attributes {dimension_semantics = [#tpu.dimension_semantics<parallel>], iteration_bounds = array<i64: 2>, scalar_prefetch = 0 : i64, scratch_operands = 0 : i64, tpu.core_type = #tpu.core_type<tc>, window_params = [{transform_indices = @transform_0, window_bounds = array<i64: 1, 8, 256>}, {pipeline_mode = #tpu.pipeline_mode<synchronous>, transform_indices = @transform_1, window_bounds = array<i64: 16, 8>}, {pipeline_mode = #tpu.pipeline_mode<synchronous>, transform_indices = @transform_2, window_bounds = array<i64: 16, 1>}, {pipeline_mode = #tpu.pipeline_mode<synchronous>, transform_indices = @transform_3, window_bounds = array<i64: 8, 8>}, {pipeline_mode = #tpu.pipeline_mode<synchronous>, transform_indices = @transform_4, window_bounds = array<i64: 8, 1>}, {pipeline_mode = #tpu.pipeline_mode<synchronous>, transform_indices = @transform_5, window_bounds = array<i64: 8, 8>}, {pipeline_mode = #tpu.pipeline_mode<synchronous>, transform_indices = @transform_6, window_bounds = array<i64: 8, 1>}, {pipeline_mode = #tpu.pipeline_mode<synchronous>, transform_indices = @transform_7, window_bounds = array<i64: 8, 8>}, {pipeline_mode = #tpu.pipeline_mode<synchronous>, transform_indices = @transform_8, window_bounds = array<i64: 8, 1>}, {pipeline_mode = #tpu.pipeline_mode<synchronous>, transform_indices = @transform_9, window_bounds = array<i64: 8, 8>}, {pipeline_mode = #tpu.pipeline_mode<synchronous>, transform_indices = @transform_10, window_bounds = array<i64: 8, 8>}, {pipeline_mode = #tpu.pipeline_mode<synchronous>, transform_indices = @transform_11, window_bounds = array<i64: 8, 1>}, {pipeline_mode = #tpu.pipeline_mode<synchronous>, transform_indices = @transform_12, window_bounds = array<i64: 256, 512>}, {pipeline_mode = #tpu.pipeline_mode<synchronous>, transform_indices = @transform_13, window_bounds = array<i64: 512, 512>}, {transform_indices = @transform_14, window_bounds = array<i64: 1, 8, 256>}]} {
    %c0 = arith.constant 0 : index
    %c0_0 = arith.constant 0 : index
    %c0_1 = arith.constant 0 : index
    %0 = vector.load %arg1[%c0, %c0_0, %c0_1] : memref<1x8x256xf32, #tpu.memory_space<vmem>>, vector<1x8x256xf32>
    %1 = vector.shape_cast %0 : vector<1x8x256xf32> to vector<8x256xf32>
    %c0_2 = arith.constant 0 : index
    %c0_3 = arith.constant 0 : index
    %2 = vector.load %arg2[%c0_2, %c0_3] : memref<16x8xf32, #tpu.memory_space<vmem>>, vector<16x8xf32>
    %cst = arith.constant dense<0.000000e+00> : vector<16x256xf32>
    %3 = tpu.matmul %2, %1, %cst {dimension_numbers = #tpu.dot_dimension_numbers<[1], [0], [0], [1], [0, 0, 1, 1], [], []>} : vector<16x8xf32>, vector<8x256xf32>, vector<16x256xf32> -> vector<16x256xf32>
    %c0_4 = arith.constant 0 : index
    %c0_5 = arith.constant 0 : index
    %4 = vector.load %arg3[%c0_4, %c0_5] : memref<16x1xf32, #tpu.memory_space<vmem>>, vector<16x1xf32>
    %5 = vector.broadcast %4 : vector<16x1xf32> to vector<16x256xf32>
    %6 = arith.addf %3, %5 : vector<16x256xf32>
    %cst_6 = arith.constant 5.000000e-01 : f32
    %7 = vector.broadcast %cst_6 : f32 to vector<16x256xf32>
    %8 = arith.mulf %7, %6 : vector<16x256xf32>
    %cst_7 = arith.constant 1.41421354 : f32
    %9 = vector.broadcast %cst_7 : f32 to vector<16x256xf32>
    %10 = arith.divf %6, %9 : vector<16x256xf32>
    %11 = math.erf %10 : vector<16x256xf32>
    %cst_8 = arith.constant 1.000000e+00 : f32
    %12 = vector.broadcast %cst_8 : f32 to vector<16x256xf32>
    %13 = arith.addf %12, %11 : vector<16x256xf32>
    %14 = arith.mulf %8, %13 : vector<16x256xf32>
    %c0_9 = arith.constant 0 : index
    %c0_10 = arith.constant 0 : index
    %15 = vector.load %arg4[%c0_9, %c0_10] : memref<8x8xf32, #tpu.memory_space<vmem>>, vector<8x8xf32>
    %16 = vector.extract_strided_slice %14 {offsets = [0, 0], sizes = [8, 256], strides = [1, 1]} : vector<16x256xf32> to vector<8x256xf32>
    %cst_11 = arith.constant dense<0.000000e+00> : vector<8x256xf32>
    %17 = tpu.matmul %15, %16, %cst_11 {dimension_numbers = #tpu.dot_dimension_numbers<[1], [0], [0], [1], [0, 0, 1, 1], [], []>} : vector<8x8xf32>, vector<8x256xf32>, vector<8x256xf32> -> vector<8x256xf32>
    %c0_12 = arith.constant 0 : index
    %c0_13 = arith.constant 0 : index
    %18 = vector.load %arg5[%c0_12, %c0_13] : memref<8x1xf32, #tpu.memory_space<vmem>>, vector<8x1xf32>
    %19 = vector.broadcast %18 : vector<8x1xf32> to vector<8x256xf32>
    %20 = arith.addf %17, %19 : vector<8x256xf32>
    %cst_14 = arith.constant 5.000000e-01 : f32
    %21 = vector.broadcast %cst_14 : f32 to vector<8x256xf32>
    %22 = arith.mulf %21, %20 : vector<8x256xf32>
    %cst_15 = arith.constant 1.41421354 : f32
    %23 = vector.broadcast %cst_15 : f32 to vector<8x256xf32>
    %24 = arith.divf %20, %23 : vector<8x256xf32>
    %25 = math.erf %24 : vector<8x256xf32>
    %cst_16 = arith.constant 1.000000e+00 : f32
    %26 = vector.broadcast %cst_16 : f32 to vector<8x256xf32>
    %27 = arith.addf %26, %25 : vector<8x256xf32>
    %28 = arith.mulf %22, %27 : vector<8x256xf32>
    %29 = vector.extract_strided_slice %14 {offsets = [8, 0], sizes = [8, 256], strides = [1, 1]} : vector<16x256xf32> to vector<8x256xf32>
    %30 = arith.truncf %29 : vector<8x256xf32> to vector<8x256xbf16>
    %c0_17 = arith.constant 0 : index
    %c0_18 = arith.constant 0 : index
    %31 = vector.load %arg13[%c0_17, %c0_18] : memref<256x512xbf16, #tpu.memory_space<vmem>>, vector<256x512xbf16>
    %cst_19 = arith.constant dense<0.000000e+00> : vector<8x512xf32>
    %32 = tpu.matmul %30, %31, %cst_19 {dimension_numbers = #tpu.dot_dimension_numbers<[1], [0], [0], [1], [0, 0, 1, 1], [], []>} : vector<8x256xbf16>, vector<256x512xbf16>, vector<8x512xf32> -> vector<8x512xf32>
    %c0_20 = arith.constant 0 : index
    %c0_21 = arith.constant 0 : index
    %33 = vector.load %arg6[%c0_20, %c0_21] : memref<8x8xf32, #tpu.memory_space<vmem>>, vector<8x8xf32>
    %34 = vector.extract_strided_slice %32 {offsets = [0, 0], sizes = [8, 256], strides = [1, 1]} : vector<8x512xf32> to vector<8x256xf32>
    %cst_22 = arith.constant dense<0.000000e+00> : vector<8x256xf32>
    %35 = tpu.matmul %33, %34, %cst_22 {dimension_numbers = #tpu.dot_dimension_numbers<[1], [0], [0], [1], [0, 0, 1, 1], [], []>} : vector<8x8xf32>, vector<8x256xf32>, vector<8x256xf32> -> vector<8x256xf32>
    %c0_23 = arith.constant 0 : index
    %c0_24 = arith.constant 0 : index
    %36 = vector.load %arg7[%c0_23, %c0_24] : memref<8x1xf32, #tpu.memory_space<vmem>>, vector<8x1xf32>
    %37 = vector.broadcast %36 : vector<8x1xf32> to vector<8x256xf32>
    %38 = arith.addf %35, %37 : vector<8x256xf32>
    %cst_25 = arith.constant 5.000000e-01 : f32
    %39 = vector.broadcast %cst_25 : f32 to vector<8x256xf32>
    %40 = arith.mulf %39, %38 : vector<8x256xf32>
    %cst_26 = arith.constant 1.41421354 : f32
    %41 = vector.broadcast %cst_26 : f32 to vector<8x256xf32>
    %42 = arith.divf %38, %41 : vector<8x256xf32>
    %43 = math.erf %42 : vector<8x256xf32>
    %cst_27 = arith.constant 1.000000e+00 : f32
    %44 = vector.broadcast %cst_27 : f32 to vector<8x256xf32>
    %45 = arith.addf %44, %43 : vector<8x256xf32>
    %46 = arith.mulf %40, %45 : vector<8x256xf32>
    %c0_28 = arith.constant 0 : index
    %c0_29 = arith.constant 0 : index
    %47 = vector.load %arg8[%c0_28, %c0_29] : memref<8x8xf32, #tpu.memory_space<vmem>>, vector<8x8xf32>
    %48 = vector.extract_strided_slice %32 {offsets = [0, 256], sizes = [8, 256], strides = [1, 1]} : vector<8x512xf32> to vector<8x256xf32>
    %cst_30 = arith.constant dense<0.000000e+00> : vector<8x256xf32>
    %49 = tpu.matmul %47, %48, %cst_30 {dimension_numbers = #tpu.dot_dimension_numbers<[1], [0], [0], [1], [0, 0, 1, 1], [], []>} : vector<8x8xf32>, vector<8x256xf32>, vector<8x256xf32> -> vector<8x256xf32>
    %c0_31 = arith.constant 0 : index
    %c0_32 = arith.constant 0 : index
    %50 = vector.load %arg9[%c0_31, %c0_32] : memref<8x1xf32, #tpu.memory_space<vmem>>, vector<8x1xf32>
    %51 = vector.broadcast %50 : vector<8x1xf32> to vector<8x256xf32>
    %52 = arith.addf %49, %51 : vector<8x256xf32>
    %cst_33 = arith.constant 5.000000e-01 : f32
    %53 = vector.broadcast %cst_33 : f32 to vector<8x256xf32>
    %54 = arith.mulf %53, %52 : vector<8x256xf32>
    %cst_34 = arith.constant 1.41421354 : f32
    %55 = vector.broadcast %cst_34 : f32 to vector<8x256xf32>
    %56 = arith.divf %52, %55 : vector<8x256xf32>
    %57 = math.erf %56 : vector<8x256xf32>
    %cst_35 = arith.constant 1.000000e+00 : f32
    %58 = vector.broadcast %cst_35 : f32 to vector<8x256xf32>
    %59 = arith.addf %58, %57 : vector<8x256xf32>
    %60 = arith.mulf %54, %59 : vector<8x256xf32>
    %61 = tpu.concatenate %46, %60 in 1 : vector<8x256xf32>, vector<8x256xf32> -> vector<8x512xf32>
    %62 = arith.truncf %61 : vector<8x512xf32> to vector<8x512xbf16>
    %c0_36 = arith.constant 0 : index
    %c0_37 = arith.constant 0 : index
    %63 = vector.load %arg14[%c0_36, %c0_37] : memref<512x512xbf16, #tpu.memory_space<vmem>>, vector<512x512xbf16>
    %cst_38 = arith.constant dense<0.000000e+00> : vector<8x512xf32>
    %64 = tpu.matmul %62, %63, %cst_38 {dimension_numbers = #tpu.dot_dimension_numbers<[1], [0], [0], [1], [0, 0, 1, 1], [], []>} : vector<8x512xbf16>, vector<512x512xbf16>, vector<8x512xf32> -> vector<8x512xf32>
    %65 = vector.extract_strided_slice %64 {offsets = [0, 0], sizes = [8, 256], strides = [1, 1]} : vector<8x512xf32> to vector<8x256xf32>
    %66 = vector.extract_strided_slice %64 {offsets = [0, 256], sizes = [8, 256], strides = [1, 1]} : vector<8x512xf32> to vector<8x256xf32>
    %67 = arith.mulf %65, %65 : vector<8x256xf32>
    %68 = arith.mulf %66, %66 : vector<8x256xf32>
    %69 = arith.addf %67, %68 : vector<8x256xf32>
    %70 = math.sqrt %69 : vector<8x256xf32>
    %c0_39 = arith.constant 0 : index
    %c0_40 = arith.constant 0 : index
    %71 = vector.load %arg10[%c0_39, %c0_40] : memref<8x8xf32, #tpu.memory_space<vmem>>, vector<8x8xf32>
    %cst_41 = arith.constant dense<0.000000e+00> : vector<8x256xf32>
    %72 = tpu.matmul %71, %28, %cst_41 {dimension_numbers = #tpu.dot_dimension_numbers<[1], [0], [0], [1], [0, 0, 1, 1], [], []>} : vector<8x8xf32>, vector<8x256xf32>, vector<8x256xf32> -> vector<8x256xf32>
    %c0_42 = arith.constant 0 : index
    %c0_43 = arith.constant 0 : index
    %73 = vector.load %arg11[%c0_42, %c0_43] : memref<8x8xf32, #tpu.memory_space<vmem>>, vector<8x8xf32>
    %cst_44 = arith.constant dense<0.000000e+00> : vector<8x256xf32>
    %74 = tpu.matmul %73, %70, %cst_44 {dimension_numbers = #tpu.dot_dimension_numbers<[1], [0], [0], [1], [0, 0, 1, 1], [], []>} : vector<8x8xf32>, vector<8x256xf32>, vector<8x256xf32> -> vector<8x256xf32>
    %75 = arith.addf %72, %74 : vector<8x256xf32>
    %c0_45 = arith.constant 0 : index
    %c0_46 = arith.constant 0 : index
    %76 = vector.load %arg12[%c0_45, %c0_46] : memref<8x1xf32, #tpu.memory_space<vmem>>, vector<8x1xf32>
    %77 = vector.broadcast %76 : vector<8x1xf32> to vector<8x256xf32>
    %78 = arith.addf %75, %77 : vector<8x256xf32>
    %c0_47 = arith.constant 0 : index
    %c0_48 = arith.constant 0 : index
    %c0_49 = arith.constant 0 : index
    %79 = vector.load %arg15[%c0_47, %c0_48, %c0_49] : memref<1x8x256xf32, #tpu.memory_space<vmem>>, vector<1x8x256xf32>
    %80 = vector.shape_cast %79 : vector<1x8x256xf32> to vector<8x256xf32>
    %81 = vector.shape_cast %78 : vector<8x256xf32> to vector<1x8x256xf32>
    tpu.vector_store %arg15[%c0_47, %c0_48, %c0_49], %81 {strides = array<i32>} : memref<1x8x256xf32, #tpu.memory_space<vmem>>, vector<1x8x256xf32>,
    return
  }
  func.func @transform_0(%arg0: i32) -> (i32, i32, i32) {
    %c0_i32 = arith.constant 0 : i32
    %c0_i32_0 = arith.constant 0 : i32
    %c0_i32_1 = arith.constant 0 : i32
    return %arg0, %c0_i32, %c0_i32_0 : i32, i32, i32
  }
  func.func @transform_1(%arg0: i32) -> (i32, i32) {
    %c0_i32 = arith.constant 0 : i32
    %c0_i32_0 = arith.constant 0 : i32
    %c0_i32_1 = arith.constant 0 : i32
    return %c0_i32, %c0_i32_0 : i32, i32
  }
  func.func @transform_2(%arg0: i32) -> (i32, i32) {
    %c0_i32 = arith.constant 0 : i32
    %c0_i32_0 = arith.constant 0 : i32
    %c0_i32_1 = arith.constant 0 : i32
    return %c0_i32, %c0_i32_0 : i32, i32
  }
  func.func @transform_3(%arg0: i32) -> (i32, i32) {
    %c0_i32 = arith.constant 0 : i32
    %c0_i32_0 = arith.constant 0 : i32
    %c0_i32_1 = arith.constant 0 : i32
    return %c0_i32, %c0_i32_0 : i32, i32
  }
  func.func @transform_4(%arg0: i32) -> (i32, i32) {
    %c0_i32 = arith.constant 0 : i32
    %c0_i32_0 = arith.constant 0 : i32
    %c0_i32_1 = arith.constant 0 : i32
    return %c0_i32, %c0_i32_0 : i32, i32
  }
  func.func @transform_5(%arg0: i32) -> (i32, i32) {
    %c0_i32 = arith.constant 0 : i32
    %c0_i32_0 = arith.constant 0 : i32
    %c0_i32_1 = arith.constant 0 : i32
    return %c0_i32, %c0_i32_0 : i32, i32
  }
  func.func @transform_6(%arg0: i32) -> (i32, i32) {
    %c0_i32 = arith.constant 0 : i32
    %c0_i32_0 = arith.constant 0 : i32
    %c0_i32_1 = arith.constant 0 : i32
    return %c0_i32, %c0_i32_0 : i32, i32
  }
  func.func @transform_7(%arg0: i32) -> (i32, i32) {
    %c0_i32 = arith.constant 0 : i32
    %c0_i32_0 = arith.constant 0 : i32
    %c0_i32_1 = arith.constant 0 : i32
    return %c0_i32, %c0_i32_0 : i32, i32
  }
  func.func @transform_8(%arg0: i32) -> (i32, i32) {
    %c0_i32 = arith.constant 0 : i32
    %c0_i32_0 = arith.constant 0 : i32
    %c0_i32_1 = arith.constant 0 : i32
    return %c0_i32, %c0_i32_0 : i32, i32
  }
  func.func @transform_9(%arg0: i32) -> (i32, i32) {
    %c0_i32 = arith.constant 0 : i32
    %c0_i32_0 = arith.constant 0 : i32
    %c0_i32_1 = arith.constant 0 : i32
    return %c0_i32, %c0_i32_0 : i32, i32
  }
  func.func @transform_10(%arg0: i32) -> (i32, i32) {
    %c0_i32 = arith.constant 0 : i32
    %c0_i32_0 = arith.constant 0 : i32
    %c0_i32_1 = arith.constant 0 : i32
    return %c0_i32, %c0_i32_0 : i32, i32
  }
  func.func @transform_11(%arg0: i32) -> (i32, i32) {
    %c0_i32 = arith.constant 0 : i32
    %c0_i32_0 = arith.constant 0 : i32
    %c0_i32_1 = arith.constant 0 : i32
    return %c0_i32, %c0_i32_0 : i32, i32
  }
  func.func @transform_12(%arg0: i32) -> (i32, i32) {
    %c0_i32 = arith.constant 0 : i32
    %c0_i32_0 = arith.constant 0 : i32
    %c0_i32_1 = arith.constant 0 : i32
    return %c0_i32, %c0_i32_0 : i32, i32
  }
  func.func @transform_13(%arg0: i32) -> (i32, i32) {
    %c0_i32 = arith.constant 0 : i32
    %c0_i32_0 = arith.constant 0 : i32
    %c0_i32_1 = arith.constant 0 : i32
    return %c0_i32, %c0_i32_0 : i32, i32
  }
  func.func @transform_14(%arg0: i32) -> (i32, i32, i32) {
    %c0_i32 = arith.constant 0 : i32
    %c0_i32_0 = arith.constant 0 : i32
    %c0_i32_1 = arith.constant 0 : i32
    return %arg0, %c0_i32, %c0_i32_0 : i32, i32, i32
  }
}

</mosaic_0001>

<bundles_post_ra>
// kernel: _pffn_pallas.1
= control target key start
LH: loop header
LB: loop body
LE: loop exit
PB: predicated region body
PF: predicated region fallthrough
CT: control target
= control target key end

     0   :  { %19 = vsyncpa [#allocation3], 0  ;;  %s4638_s0 = inlined_call_operand.vmem [shape: f32[2,8,256], index: 0, kind: input, shape index: {}]   ;;  %s4639_s1 = inlined_call_operand.vmem [shape: f32[16,8], index: 1, kind: input, shape index: {}]   ;;  %s4640_s2 = inlined_call_operand.vmem [shape: f32[16,1], index: 2, kind: input, shape index: {}]   ;;  %s4641_s3 = inlined_call_operand.vmem [shape: f32[8,8], index: 3, kind: input, shape index: {}]   ;;  %s4642_s4 = inlined_call_operand.vmem [shape: f32[8,1], index: 4, kind: input, shape index: {}]   ;;  %s4643_s5 = inlined_call_operand.vmem [shape: f32[8,8], index: 5, kind: input, shape index: {}]   ;;  %s4644_s6 = inlined_call_operand.vmem [shape: f32[8,1], index: 6, kind: input, shape index: {}]   ;;  %s4645_s7 = inlined_call_operand.vmem [shape: f32[8,8], index: 7, kind: input, shape index: {}]   ;;  %s4646_s8 = inlined_call_operand.vmem [shape: f32[8,1], index: 8, kind: input, shape index: {}]   ;;  %s4647_s9 = inlined_call_operand.vmem [shape: f32[8,8], index: 9, kind: input, shape index: {}]   ;;  %s4648_s10 = inlined_call_operand.vmem [shape: f32[8,8], index: 10, kind: input, shape index: {}]   ;;  %s4649_s11 = inlined_call_operand.vmem [shape: f32[8,1], index: 11, kind: input, shape index: {}]   ;;  %s4650_s12 = inlined_call_operand.hbm [shape: bf16[256,512], index: 12, kind: input, shape index: {}]   ;;  %s4651_s13 = inlined_call_operand.hbm [shape: bf16[512,512], index: 13, kind: input, shape index: {}]   ;;  %s4652_s14 = inlined_call_operand.vmem [shape: f32[2,8,256], index: 14, kind: output, shape index: {}]  }
   0x1   :  { %20 = vsyncpa [#allocation5], 0  ;;  %s4063_s29 = smov 0  }
   0x2 LB: > { %s400_s16 = sshll.u32 %s4650_s12, 4  ;;  %s2843_s17 = sadd.s32 4294967295, %s3980_s29   ;;  %s3980_s29 = sphi %s4063_s29, %s26_s29   ;;  %s401_s16 = int_to_ptr.hbm [resolvable:$true] %s400_s16 }
   0x3   : > { %p2845_p0 = scmp.ge.s32.totalorder %s3980_s29, 1  ;;  %p356_p1 = scmp.lt.s32.totalorder %s3980_s29, 3 }
   0x4   : > { %p3859_p2 = scmp.eq.s32.totalorder %s2843_s17, 0  ;;  %s3982_s19 = smov [#allocation2]  }
   0x5   : > { %p4074_p3 = pnand %p2845_p0, %p356_p1  ;;  %s402_s20 = sshll.u32 %s3982_s19, 4  ;;  %s403_s20 = int_to_ptr.vmem [resolvable:$true] %s402_s20 }
   0x6   : > { %s414_s23 = sshll.u32 %s4651_s13, 4  ;;  %s3983_s24 = smov [#allocation4]   ;;  %s415_s23 = int_to_ptr.hbm [resolvable:$true] %s414_s23 }
   0x7   : > { %p3852_p4 = pneg %p4074_p3  ;;  %s416_s25 = sshll.u32 %s3983_s24, 4  ;;  %s417_s25 = int_to_ptr.vmem [resolvable:$true] %s416_s25 }
   0x8   : > { %s3984_s26 = smov 256   ;;  %s3985_s27 = smov 16  }
   0x9   : > { %p3853_p5 = pnand %p3859_p2, %p3852_p4  ;;  %440 = sbr.rel (%p4074_p3) target bundleno = 959 (0x3bf), region = 76 }
   0xb   : > { %3855 = dma.hbm_to_vmem [thread:$0]  (!%p3853_p5), %s401_s16, 8192, %s403_s20, [#allocation3], %s3984_s26, %s3984_s26, %s3985_s27  }
   0xc   : > { %3858 = dma.hbm_to_vmem [thread:$0]  (!%p3853_p5), %s415_s23, 16384, %s417_s25, [#allocation5], %s3984_s26, %s3984_s26, %s3985_s27  }
   0xe   : > { %3971 = dma.done.wait (%p3859_p2), [#allocation3], 8192  }
   0xf   : > { %3973 = vsyncadd (%p3859_p2), [#allocation3], 4294959104 }
  0x10   : > { %3975 = dma.done.wait (%p3859_p2), [#allocation5], 16384  }
  0x11   : > { %3977 = vsyncadd (%p3859_p2), [#allocation5], 4294950912  ;;  %p492_p6 = scmp.lt.s32.totalorder %s2843_s17, 1  ;;  %v3986_v0 = vmov 0   ;;  %vm518_vm0 = vcmask 64512   ;;  %v504_v3 = vld [vmem:[%s4639_s1] sm:$0xff] }
  0x12   : > { %3877 = vset.pattern.permute.xlu0 %v3986_v0  ;;  %3879 = vset.pattern.permute.xlu2 %v3986_v0  ;;  %v506_v4 = vld [vmem:[%s4640_s2] sm:$0xff]  ;;  %v505_v5 = vld [vmem:[%s4639_s1 + $0x8] sm:$0xff]  ;;  %v3987_v7 = vmov 1.4142135   ;;  %v3682_v12 = vld [vmem:[#allocation2 + $0xec] sm:$0xf0] }
  0x13   : > { %s4677_s17 = smov (!%p492_p6, %s2843_s17), 1  ;;  %3878 = vset.pattern.permute.xlu1 %v3986_v0  ;;  %510 = vperm.xlu0 %3877, %v506_v4   ;;  %v507_v6 = vld [vmem:[%s4640_s2 + $0x8] sm:$0xff]  ;;  %3880 = vrcp.f32 %v3987_v7  ;;  %v2982_v11 = vld [vmem:[#allocation2 + $0xe0] sm:$0xf]  ;;  %v3714_v15 = vld [vmem:[#allocation2 + $0x1ec] sm:$0xf0] }
  0x14   : > { %s3650_s28 = sshll.u32 %s4677_s17, 4  ;;  %v3110_v13 = vld [vmem:[#allocation2 + $0x1e0] sm:$0xf]  ;;  %v2983_v14 = vor.u32 %v3682_v12, %v2982_v11  ;;  %v3678_v19 = vld [vmem:[#allocation2 + $0xcc] sm:$0xf0] }
  0x15   : > { %s496_s16 = scalar_lea.vmem %s4638_s0, %s3650_s28  ;;  %v3111_v16 = vor.u32 %v3714_v15, %v3110_v13  ;;  %v2966_v18 = vld [vmem:[#allocation2 + $0xc0] sm:$0xf]  ;;  %v3710_v22 = vld [vmem:[#allocation2 + $0x1cc] sm:$0xf0]  ;;  %s501_s20 = scalar_lea.vmem %s4652_s14, %s3650_s28 }
  0x16   : > { %v502_v1 = vld [vmem:[%s496_s16] sm:$0xff]  ;;  %v503_v2 = vld [vmem:[%s496_s16 + $0x8] sm:$0xff]  ;;  %v2967_v21 = vor.u32 %v3678_v19, %v2966_v18  ;;  %v3674_v26 = vld [vmem:[#allocation2 + $0xac] sm:$0xf0] }
  0x17   : > { %540 = vmatpush.msra.mxu0 %v502_v1  ;;  %563 = vmatpush.msra.mxu1 %v503_v2  ;;  %v3094_v20 = vld [vmem:[#allocation2 + $0x1c0] sm:$0xf]  ;;  %v3706_v30 = vld [vmem:[#allocation2 + $0x1ac] sm:$0xf0] }
  0x18   : > { %2856 = vmatmul.msk.f32.vlgmr.msra.gmra.mxu0 %vm518_vm0, %v504_v3  ;;  %2858 = vmatmul.msk.f32.vlgmr.msra.gmra.mxu1 %vm518_vm0, %v504_v3  ;;  %v3095_v23 = vor.u32 %v3710_v22, %v3094_v20  ;;  %v2950_v25 = vld [vmem:[#allocation2 + $0xa0] sm:$0xf]  ;;  %v3670_v36 = vld [vmem:[#allocation2 + $0x8c] sm:$0xf0] }
  0x19   : > { %v3881_v8 = vpop.eup %3880  ;;  %1278 = vmatpush.bf16.msrb.mxu0 %v2983_v14  ;;  %1291 = vmatpush.bf16.msrb.mxu1 %v3111_v16  ;;  %v3078_v27 = vld [vmem:[#allocation2 + $0x1a0] sm:$0xf]  ;;  %v2951_v29 = vor.u32 %v3674_v26, %v2950_v25  ;;  %v3702_v41 = vld [vmem:[#allocation2 + $0x18c] sm:$0xf0] }
  0x1a   : > { %v576_v9 = vmul.f32 1.4142135, %v3881_v8  ;;  %vm580_vm1 = vweird.f32 %v3881_v8  ;;  %v3079_v31 = vor.u32 %v3706_v30, %v3078_v27  ;;  %v2934_v35 = vld [vmem:[#allocation2 + $0x80] sm:$0xf]  ;;  %v3666_v46 = vld [vmem:[#allocation2 + $0x6c] sm:$0xf0] }
  0x1b   : > { %515 = vperm.xlu0 %3877, %v507_v6   ;;  %v3062_v37 = vld [vmem:[#allocation2 + $0x180] sm:$0xf]  ;;  %v2935_v40 = vor.u32 %v3670_v36, %v2934_v35  ;;  %v3698_v51 = vld [vmem:[#allocation2 + $0x16c] sm:$0xf0] }
  0x1c   : > { %v577_v10 = vsub.f32 1.0, %v576_v9  ;;  %v3063_v42 = vor.u32 %v3702_v41, %v3062_v37  ;;  %v2918_v45 = vld [vmem:[#allocation2 + $0x60] sm:$0xf]  ;;  %v3662_v59 = vld [vmem:[#allocation2 + $0x4c] sm:$0xf0] }
  0x1d   : > { %1279 = vmatpush.bf16.msrb.mxu0 %v2967_v21  ;;  %1292 = vmatpush.bf16.msrb.mxu1 %v3095_v23  ;;  %v3046_v47 = vld [vmem:[#allocation2 + $0x160] sm:$0xf]  ;;  %v2919_v50 = vor.u32 %v3666_v46, %v2918_v45  ;;  %v3694_v1 = vld [vmem:[#allocation2 + $0x14c] sm:$0xf0] }
  0x1e   : > { %v578_v17 = vmul.f32 %v3881_v8, %v577_v10  ;;  %v3047_v52 = vor.u32 %v3698_v51, %v3046_v47  ;;  %v2902_v58 = vld [vmem:[#allocation2 + $0x40] sm:$0xf]  ;;  %v3658_v11 = vld [vmem:[#allocation2 + $0x2c] sm:$0xf0]  ;;  %v2990_v47 = vld [vmem:[#allocation2 + $0xe8] sm:$0xf] }
  0x1f   : > { %v3030_v60 = vld [vmem:[#allocation2 + $0x140] sm:$0xf]  ;;  %v2903_v2 = vor.u32 %v3662_v59, %v2902_v58  ;;  %v3690_v16 = vld [vmem:[#allocation2 + $0x12c] sm:$0xf0]  ;;  %v2974_v58 = vld [vmem:[#allocation2 + $0xc8] sm:$0xf] }
  0x20   : > { %2857 = vmatmul.msk.f32.gmra.mxu0 %vm518_vm0, %v505_v5  ;;  %2859 = vmatmul.msk.f32.gmra.mxu1 %vm518_vm0, %v505_v5  ;;  %v579_v24 = vadd.f32 %v3881_v8, %v578_v17  ;;  %v3031_v3 = vor.u32 %v3694_v1, %v3030_v60  ;;  %v2886_v10 = vld [vmem:[#allocation2 + $0x20] sm:$0xf]  ;;  %v3654_v26 = vld [vmem:[#allocation2 + $0xc] sm:$0xf0]  ;;  %v3679_v59 = vld [vmem:[#allocation2 + $0xd4] sm:$0xf0] }
  0x21   : > { %1280 = vmatpush.bf16.msrb.mxu0 %v2951_v29  ;;  %1293 = vmatpush.bf16.msrb.mxu1 %v3079_v31  ;;  %v2887_v14 = vor.u32 %v3658_v11, %v2886_v10  ;;  %v3014_v15 = vld [vmem:[#allocation2 + $0x120] sm:$0xf]  ;;  %v3711_v10 = vld [vmem:[#allocation2 + $0x1d4] sm:$0xf0] }
  0x22   : > { %v4114_v33 = vsel %vm580_vm1, %v3881_v8, %v579_v24  ;;  %v3015_v18 = vor.u32 %v3690_v16, %v3014_v15  ;;  %v2870_v25 = vld [vmem:[#allocation2] sm:$0xf] }
  0x23   : > { %v2998_v29 = vld [vmem:[#allocation2 + $0x100] sm:$0xf] }
  0x25   : > { %1281 = vmatpush.bf16.msrb.mxu0 %v2935_v40  ;;  %1294 = vmatpush.bf16.msrb.mxu1 %v3063_v42 }
  0x29   : > { %1282 = vmatpush.bf16.msrb.mxu0 %v2919_v50  ;;  %1295 = vmatpush.bf16.msrb.mxu1 %v3047_v52 }
  0x2d   : > { %1283 = vmatpush.bf16.msrb.mxu0 %v2903_v2  ;;  %1296 = vmatpush.bf16.msrb.mxu1 %v3031_v3 }
  0x31   : > { %1284 = vmatpush.bf16.msrb.mxu0 %v2887_v14  ;;  %1297 = vmatpush.bf16.msrb.mxu1 %v3015_v18 }
  0x85   : > { %v511_v28 = vpop.permute.xlu0 %510 }
  0x8d   : > { %v516_v53 = vpop.permute.xlu0 %515 }
  0x95   : > { %v542_v32 = vpop.f32.mrf.mxu0  ;;  %v565_v34 = vpop.f32.mrf.mxu1 }
  0x96   : > { %v4116_v38 = vadd.f32 %v542_v32, %v511_v28  ;;  %v4118_v39 = vadd.f32 %v565_v34, %v511_v28  ;;  %v2871_v32 = vor.u32 %v3654_v26, %v2870_v25  ;;  %v3686_v34 = vld [vmem:[#allocation2 + $0x10c] sm:$0xf0] }
  0x97   : > { %v2999_v40 = vor.u32 %v3686_v34, %v2998_v29 }
  0x98   : > { %v4122_v43 = vmul.f32 %v4114_v33, %v4116_v38  ;;  %v4126_v44 = vmul.f32 %v4114_v33, %v4118_v39  ;;  %1285 = vmatpush.bf16.msrb.mxu0 %v2871_v32 }
  0x99   : > { %1298 = vmatpush.bf16.msrb.mxu1 %v2999_v40 }
  0x9a   : > { %v586_v48 = vmul.f32 %v4122_v43, %v4122_v43  ;;  %v626_v49 = vmul.f32 %v4126_v44, %v4126_v44 }
  0x9c   : > { %v4132_v54 = vmin.f32 %v586_v48, 16.0  ;;  %v4134_v55 = vmin.f32 %v626_v49, 16.0  ;;  %v3683_v48 = vld [vmem:[#allocation2 + $0xf4] sm:$0xf0]  ;;  %v3118_v49 = vld [vmem:[#allocation2 + $0x1e8] sm:$0xf] }
  0x9d   : > { %v545_v56 = vpop.f32.mrf.mxu0  ;;  %v568_v57 = vpop.f32.mrf.mxu1 }
  0x9e   : > { %v588_v61 = vmul.f32 2.1237322e-06, %v4132_v54  ;;  %v628_v62 = vmul.f32 2.1237322e-06, %v4134_v55  ;;  %v4138_v63 = vadd.f32 %v545_v56, %v516_v53  ;;  %v4140_v0 = vadd.f32 %v568_v57, %v516_v53  ;;  %v3715_v57 = vld [vmem:[#allocation2 + $0x1f4] sm:$0xf0] }
  0x9f   : > { %v599_v4 = vmul.f32 3.8918573e-05, %v4132_v54  ;;  %v639_v8 = vmul.f32 3.8918573e-05, %v4134_v55  ;;  %v2991_v56 = vor.u32 %v3683_v48, %v2990_v47  ;;  %v3119_v1 = vor.u32 %v3715_v57, %v3118_v49 }
  0xa0   : > { %v589_v5 = vadd.f32 0.00028619796, %v588_v61  ;;  %v629_v6 = vadd.f32 0.00028619796, %v628_v62  ;;  %v4145_v7 = vmul.f32 %v4114_v33, %v4138_v63  ;;  %v4150_v9 = vmul.f32 %v4114_v33, %v4140_v0 }
  0xa1   : > { %v600_v19 = vadd.f32 0.001143296, %v599_v4  ;;  %v640_v23 = vadd.f32 0.001143296, %v639_v8  ;;  %1330 = vmatpush.bf16.msra.mxu0 %v2991_v56  ;;  %1343 = vmatpush.bf16.msra.mxu1 %v3119_v1  ;;  %v3102_v8 = vld [vmem:[#allocation2 + $0x1c8] sm:$0xf] }
  0xa2   : > { %v590_v12 = vmul.f32 %v589_v5, %v4132_v54  ;;  %v666_v13 = vmul.f32 %v4145_v7, %v4145_v7  ;;  %v706_v17 = vmul.f32 %v4150_v9, %v4150_v9  ;;  %v630_v21 = vmul.f32 %v629_v6, %v4134_v55 }
  0xa3   : > { %v601_v50 = vmul.f32 %v600_v19, %v4132_v54  ;;  %v2975_v5 = vor.u32 %v3679_v59, %v2974_v58  ;;  %v3103_v16 = vor.u32 %v3711_v10, %v3102_v8  ;;  %v4202_v1 = vmul.f32 0.5, %v4138_v63  ;;  %v3086_v63 = vld [vmem:[#allocation2 + $0x1a8] sm:$0xf] }
  0xa4   : > { %v591_v20 = vadd.f32 0.0036580483, %v590_v12  ;;  %v4158_v22 = vmin.f32 %v666_v13, 16.0  ;;  %v4160_v24 = vmin.f32 %v706_v17, 16.0  ;;  %v631_v36 = vadd.f32 0.0036580483, %v630_v21 }
  0xa5   : > { %v602_v11 = vadd.f32 0.014752088, %v601_v50  ;;  %v641_v12 = vmul.f32 %v640_v23, %v4134_v55  ;;  %1331 = vmatpush.bf16.msra.mxu0 %v2975_v5  ;;  %1344 = vmatpush.bf16.msra.mxu1 %v3103_v16 }
  0xa6   : > { %v668_v27 = vmul.f32 2.1237322e-06, %v4158_v22  ;;  %v679_v28 = vmul.f32 3.8918573e-05, %v4158_v22  ;;  %v708_v30 = vmul.f32 2.1237322e-06, %v4160_v24  ;;  %v592_v35 = vmul.f32 %v591_v20, %v4132_v54 }
  0xa7   : > { %v719_v31 = vmul.f32 3.8918573e-05, %v4160_v24  ;;  %v632_v61 = vmul.f32 %v631_v36, %v4134_v55  ;;  %v603_v19 = vmul.f32 %v602_v11, %v4132_v54  ;;  %v2958_v11 = vld [vmem:[#allocation2 + $0xa8] sm:$0xf] }
  0xa8   : > { %v669_v37 = vadd.f32 0.00028619796, %v668_v27  ;;  %v680_v41 = vadd.f32 0.001143296, %v679_v28  ;;  %v709_v42 = vadd.f32 0.00028619796, %v708_v30 }
  0xa9   : > { %v720_v45 = vadd.f32 0.001143296, %v719_v31  ;;  %v593_v60 = vadd.f32 0.05243302, %v592_v35  ;;  %v633_v17 = vadd.f32 0.05243302, %v632_v61 }
  0xaa   : > { %v670_v46 = vmul.f32 %v669_v37, %v4158_v22  ;;  %v681_v51 = vmul.f32 %v680_v41, %v4158_v22  ;;  %v710_v52 = vmul.f32 %v709_v42, %v4160_v24  ;;  %v604_v23 = vadd.f32 0.112945676, %v603_v19 }
  0xab   : > { %v721_v53 = vmul.f32 %v720_v45, %v4160_v24  ;;  %v594_v20 = vmul.f32 %v593_v60, %v4132_v54  ;;  %v642_v30 = vadd.f32 0.014752088, %v641_v12  ;;  %v634_v31 = vmul.f32 %v633_v17, %v4134_v55  ;;  %v3675_v12 = vld [vmem:[#allocation2 + $0xb4] sm:$0xf0] }
  0xac   : > { %v671_v62 = vadd.f32 0.0036580483, %v670_v46  ;;  %v682_v2 = vadd.f32 0.014752088, %v681_v51  ;;  %v711_v3 = vadd.f32 0.0036580483, %v710_v52  ;;  %v605_v34 = vmul.f32 %v604_v23, %v4132_v54 }
  0xad   : > { %v722_v4 = vadd.f32 0.014752088, %v721_v53  ;;  %v595_v35 = vadd.f32 0.18741608, %v594_v20  ;;  %v643_v40 = vmul.f32 %v642_v30, %v4134_v55  ;;  %v635_v48 = vadd.f32 0.18741608, %v634_v31 }
  0xae   : > { %v672_v6 = vmul.f32 %v671_v62, %v4158_v22  ;;  %v683_v13 = vmul.f32 %v682_v2, %v4158_v22  ;;  %v712_v14 = vmul.f32 %v711_v3, %v4160_v24  ;;  %v606_v42 = vadd.f32 0.4994258, %v605_v34  ;;  %v3707_v17 = vld [vmem:[#allocation2 + $0x1b4] sm:$0xf0] }
  0xaf   : > { %v723_v15 = vmul.f32 %v722_v4, %v4160_v24  ;;  %v644_v47 = vadd.f32 0.112945676, %v643_v40  ;;  %v596_v51 = vmul.f32 %v595_v35, %v4132_v54  ;;  %v636_v59 = vmul.f32 %v635_v48, %v4134_v55  ;;  %v3703_v35 = vld [vmem:[#allocation2 + $0x194] sm:$0xf0] }
  0xb0   : > { %v673_v18 = vadd.f32 0.05243302, %v672_v6  ;;  %v684_v21 = vadd.f32 0.112945676, %v683_v13  ;;  %v713_v25 = vadd.f32 0.05243302, %v712_v14  ;;  %v607_v50 = vmul.f32 %v606_v42, %v4132_v54 }
  0xb1   : > { %v724_v26 = vadd.f32 0.112945676, %v723_v15  ;;  %v645_v58 = vmul.f32 %v644_v47, %v4134_v55  ;;  %v597_v61 = vadd.f32 1.1283791, %v596_v51  ;;  %v4205_v2 = vmul.f32 0.5, %v4116_v38 }
  0xb2   : > { %v674_v27 = vmul.f32 %v673_v18, %v4158_v22  ;;  %v685_v28 = vmul.f32 %v684_v21, %v4158_v22  ;;  %v714_v32 = vmul.f32 %v713_v25, %v4160_v24  ;;  %v4194_v57 = vadd.f32 1.0, %v607_v50  ;;  %v2926_v47 = vld [vmem:[#allocation2 + $0x68] sm:$0xf]  ;;  %v3667_v50 = vld [vmem:[#allocation2 + $0x74] sm:$0xf0] }
  0xb3   : > { %v725_v29 = vmul.f32 %v724_v26, %v4160_v24  ;;  %v646_v3 = vadd.f32 0.4994258, %v645_v58  ;;  %v4207_v4 = vadd.f32 1.1283791, %v636_v59  ;;  %v4211_v8 = vmul.f32 %v597_v61, %v4122_v43  ;;  %v2942_v26 = vld [vmem:[#allocation2 + $0x88] sm:$0xf] }
  0xb4   : > { %v686_v36 = vadd.f32 0.4994258, %v685_v28  ;;  %v675_v41 = vadd.f32 0.18741608, %v674_v27  ;;  %v715_v49 = vadd.f32 0.18741608, %v714_v32  ;;  %v2959_v16 = vor.u32 %v3675_v12, %v2958_v11 }
  0xb5   : > { %v726_v37 = vadd.f32 0.4994258, %v725_v29  ;;  %v647_v10 = vmul.f32 %v646_v3, %v4134_v55  ;;  %v3087_v20 = vor.u32 %v3707_v17, %v3086_v63  ;;  %v3671_v27 = vld [vmem:[#allocation2 + $0x94] sm:$0xf0]  ;;  %v3070_v29 = vld [vmem:[#allocation2 + $0x188] sm:$0xf]  ;;  %vm614_vm10 = vweird.f32 %v4194_v57 }
  0xb6   : > { %v687_v45 = vmul.f32 %v686_v36, %v4158_v22  ;;  %v676_v56 = vmul.f32 %v675_v41, %v4158_v22  ;;  %v716_v60 = vmul.f32 %v715_v49, %v4160_v24  ;;  %1332 = vmatpush.bf16.msra.mxu0 %v2959_v16  ;;  %v618_v32 = vand.u32 2147483647, %v4194_v57  ;;  %v3054_v51 = vld [vmem:[#allocation2 + $0x168] sm:$0xf]  ;;  %v3680_v16 = vld [vmem:[#allocation2 + $0xe4] sm:$0xf] }
  0xb7   : > { %v727_v46 = vmul.f32 %v726_v37, %v4160_v24  ;;  %v4225_v19 = vadd.f32 1.0, %v647_v10  ;;  %1345 = vmatpush.bf16.msra.mxu1 %v3087_v20  ;;  %v620_v34 = vand.u32 2147483648, %v4194_v57  ;;  %v2943_v37 = vor.u32 %v3671_v27, %v2942_v26  ;;  %v3695_v10 = vld [vmem:[#allocation2 + $0x154] sm:$0xf0]  ;;  %v2984_v17 = vld [vmem:[#allocation2 + $0xf0] sm:$0xf0] }
  0xb8   : > { %v688_v52 = vadd.f32 1.0, %v687_v45  ;;  %v677_v54 = vadd.f32 1.1283791, %v676_v56  ;;  %v717_v5 = vadd.f32 1.1283791, %v716_v60  ;;  %v3071_v40 = vor.u32 %v3703_v35, %v3070_v29 }
  0xb9   : > { %v4191_v53 = vadd.f32 1.0, %v727_v46  ;;  %vm619_vm13 = vcmp.eq.f32.partialorder %v618_v32, 8.507059e+37  ;;  %v621_v61 = vor.u32 1.1754944e-38, %v620_v34  ;;  %v658_v63 = vand.u32 2147483647, %v4225_v19 }
  0xba   : > { %3882 = vrcp.f32 %v688_v52  ;;  %v698_v62 = vand.u32 2147483647, %v688_v52  ;;  %v700_v22 = vand.u32 2147483648, %v688_v52  ;;  %v678_v38 = vmul.f32 %v677_v54, %v4145_v7  ;;  %1333 = vmatpush.bf16.msra.mxu0 %v2943_v37  ;;  %v2910_v54 = vld [vmem:[#allocation2 + $0x48] sm:$0xf] }
  0xbb   : > { %3884 = vrcp.f32 %v4191_v53  ;;  %v738_v24 = vand.u32 2147483647, %v4191_v53  ;;  %vm694_vm3 = vweird.f32 %v688_v52  ;;  %v740_v7 = vand.u32 2147483648, %v4191_v53  ;;  %1346 = vmatpush.bf16.msra.mxu1 %v3071_v40  ;;  %v3655_v42 = vld [vmem:[#allocation2 + $0x14] sm:$0xf0] }
  0xbc   : > { %3886 = vrcp.f32 %v4194_v57  ;;  %vm4217_vm2 = vcmp.eq.f32.partialorder %v698_v62, 8.507059e+37  ;;  %v701_v43 = vor.u32 1.1754944e-38, %v700_v22  ;;  %v718_v48 = vmul.f32 %v717_v5, %v4150_v9  ;;  %v3663_v62 = vld [vmem:[#allocation2 + $0x54] sm:$0xf0]  ;;  %v3032_v29 = vld [vmem:[#allocation2 + $0x150] sm:$0xf0] }
  0xbd   : > { %vm4230_vm5 = vcmp.eq.f32.partialorder %v738_v24, 8.507059e+37  ;;  %3888 = vrcp.f32 %v4225_v19  ;;  %v741_v45 = vor.u32 1.1754944e-38, %v740_v7  ;;  %vm734_vm9 = vweird.f32 %v4191_v53  ;;  %v3659_v7 = vld [vmem:[#allocation2 + $0x34] sm:$0xf0] }
  0xbe   : > { %v2927_v9 = vor.u32 %v3667_v50, %v2926_v47  ;;  %vm654_vm15 = vweird.f32 %v4225_v19  ;;  %vm4275_vm1 = vcmp.eq.f32.partialorder %v658_v63, 8.507059e+37  ;;  %v2987_v40 = vor.u32 %v3680_v16, %v2984_v17  ;;  %v3687_v50 = vld [vmem:[#allocation2 + $0x114] sm:$0xf0]  ;;  %v3064_v16 = vld [vmem:[#allocation2 + $0x190] sm:$0xf0] }
  0xc0   : > { %v3883_v6 = vpop.eup %3882  ;;  %1334 = vmatpush.bf16.msra.mxu0 %v2927_v9  ;;  %v3712_v9 = vld [vmem:[#allocation2 + $0x1e4] sm:$0xf] }
  0xc1   : > { %v4214_v13 = vpop.eup %3884  ;;  %v690_v14 = vmul.f32 %v3883_v6, %v688_v52  ;;  %vm695_vm4 = vweird.f32 %v3883_v6  ;;  %v3699_v52 = vld [vmem:[#allocation2 + $0x174] sm:$0xf0] }
  0xc2   : > { %v4221_v18 = vpop.eup %3886  ;;  %v730_v55 = vmul.f32 %v4214_v13, %v4191_v53  ;;  %vm735_vm6 = vweird.f32 %v4214_v13  ;;  %vm4241_vm7 = vmor %vm694_vm3, %vm695_vm4  ;;  %v3055_v59 = vor.u32 %v3699_v52, %v3054_v51  ;;  %v3676_v51 = vld [vmem:[#allocation2 + $0xc4] sm:$0xf]  ;;  %v2968_v52 = vld [vmem:[#allocation2 + $0xd0] sm:$0xf0] }
  0xc3   : > { %v691_v21 = vsub.f32 1.0, %v690_v14  ;;  %v610_v25 = vmul.f32 %v4221_v18, %v4194_v57  ;;  %vm615_vm8 = vweird.f32 %v4221_v18  ;;  %vm736_vm11 = vmor %vm734_vm9, %vm735_vm6  ;;  %v4256_v60 = vpop.eup %3888 }
  0xc4   : > { %v731_v23 = vsub.f32 1.0, %v730_v55  ;;  %vm616_vm12 = vmor %vm614_vm10, %vm615_vm8  ;;  %v650_v24 = vmul.f32 %v4256_v60, %v4225_v19  ;;  %1347 = vmatpush.bf16.msra.mxu1 %v3055_v59  ;;  %vm655_vm14 = vweird.f32 %v4256_v60  ;;  %v2971_v59 = vor.u32 %v3676_v51, %v2968_v52 }
  0xc5   : > { %v692_v30 = vmul.f32 %v3883_v6, %v691_v21  ;;  %v611_v31 = vsub.f32 1.0, %v610_v25  ;;  %v2894_v21 = vld [vmem:[#allocation2 + $0x28] sm:$0xf] }
  0xc6   : > { %v732_v36 = vmul.f32 %v4214_v13, %v731_v23  ;;  %v651_v15 = vsub.f32 1.0, %v650_v24  ;;  %v3022_v23 = vld [vmem:[#allocation2 + $0x128] sm:$0xf]  ;;  %v3096_v24 = vld [vmem:[#allocation2 + $0x1d0] sm:$0xf0] }
  0xc7   : > { %v693_v41 = vadd.f32 %v3883_v6, %v692_v30  ;;  %v612_v46 = vmul.f32 %v4221_v18, %v611_v31 }
  0xc8   : > { %v733_v49 = vadd.f32 %v4214_v13, %v732_v36  ;;  %v652_v27 = vmul.f32 %v4256_v60, %v651_v15  ;;  %v638_v36 = vmul.f32 %v4207_v4, %v4126_v44  ;;  %v3700_v15 = vld [vmem:[#allocation2 + $0x184] sm:$0xf] }
  0xc9   : > { %v697_v56 = vsel %vm4241_vm7, %v3883_v6, %v693_v41  ;;  %v613_v58 = vadd.f32 %v4221_v18, %v612_v46  ;;  %v3038_v6 = vld [vmem:[#allocation2 + $0x148] sm:$0xf] }
  0xca   : > { %v702_v53 = vsel %vm4217_vm2, %v701_v43, %v697_v56  ;;  %v737_v57 = vsel %vm736_vm11, %v4214_v13, %v733_v49  ;;  %v660_v13 = vand.u32 2147483648, %v4225_v19  ;;  %v574_v43 = vmul.f32 0.5, %v4140_v0  ;;  %vm4283_vm2 = vmor %vm654_vm15, %vm655_vm14  ;;  %v2878_v41 = vld [vmem:[#allocation2 + $0x8] sm:$0xf] }
  0xcb   : > { %v703_v22 = vmul.f32 %v702_v53, %v678_v38  ;;  %v742_v3 = vsel %vm4230_vm5, %v741_v45, %v737_v57  ;;  %v617_v5 = vsel %vm616_vm12, %v4221_v18, %v613_v58  ;;  %v2911_v18 = vor.u32 %v3663_v62, %v2910_v54  ;;  %v3006_v45 = vld [vmem:[#allocation2 + $0x108] sm:$0xf]  ;;  %v3672_v53 = vld [vmem:[#allocation2 + $0xa4] sm:$0xf]  ;;  %v2952_v57 = vld [vmem:[#allocation2 + $0xb0] sm:$0xf0] }
  0xcc   : > { %v743_v11 = vmul.f32 %v742_v3, %v718_v48  ;;  %v622_v12 = vsel %vm619_vm13, %v621_v61, %v617_v5  ;;  %v3039_v20 = vor.u32 %v3695_v10, %v3038_v6  ;;  %v2895_v0 = vor.u32 %v3659_v7, %v2894_v21  ;;  %v754_v48 = vld [vmem:[%s4641_s3] sm:$0xff]  ;;  %v2936_v10 = vld [vmem:[#allocation2 + $0x90] sm:$0xf0] }
  0xcd   : > { %v2862_v14 = vclamps-f32 %v703_v22, 1.0  ;;  %v623_v38 = vmul.f32 %v622_v12, %v4211_v8  ;;  %v3691_v8 = vld [vmem:[#allocation2 + $0x134] sm:$0xf0]  ;;  %1335 = vmatpush.bf16.msra.mxu0 %v2911_v18  ;;  %v653_v34 = vadd.f32 %v4256_v60, %v652_v27  ;;  %v661_v35 = vor.u32 1.1754944e-38, %v660_v13  ;;  %v3708_v3 = vld [vmem:[#allocation2 + $0x1c4] sm:$0xf] }
  0xce   : > { %v2863_v55 = vclamps-f32 %v743_v11, 1.0  ;;  %1348 = vmatpush.bf16.msra.mxu1 %v3039_v20  ;;  %v3023_v30 = vor.u32 %v3691_v8, %v3022_v23  ;;  %v2879_v49 = vor.u32 %v3655_v42, %v2878_v41  ;;  %v572_v61 = vmul.f32 0.5, %v4118_v39  ;;  %v3668_v6 = vld [vmem:[#allocation2 + $0x84] sm:$0xf]  ;;  %v3080_v13 = vld [vmem:[#allocation2 + $0x1b0] sm:$0xf0] }
  0xcf   : > { %v748_v25 = vadd.f32 1.0, %v2862_v14  ;;  %v2860_v26 = vclamps-f32 %v623_v38, 1.0  ;;  %v657_v47 = vsel %vm4283_vm2, %v4256_v60, %v653_v34  ;;  %v3112_v60 = vld [vmem:[#allocation2 + $0x1f0] sm:$0xf0]  ;;  %v2955_v5 = vor.u32 %v3672_v53, %v2952_v57  ;;  %v3704_v12 = vld [vmem:[#allocation2 + $0x1a4] sm:$0xf] }
  0xd0   : > { %v749_v28 = vadd.f32 1.0, %v2863_v55  ;;  %v662_v4 = vsel %vm4275_vm1, %v661_v35, %v657_v47  ;;  %v3115_v22 = vor.u32 %v3712_v9, %v3112_v60  ;;  %v3099_v11 = vor.u32 %v3708_v3, %v3096_v24  ;;  %v3664_v14 = vld [vmem:[#allocation2 + $0x64] sm:$0xf]  ;;  %v2920_v39 = vld [vmem:[#allocation2 + $0x70] sm:$0xf0] }
  0xd1   : > { %v752_v31 = vmul.f32 %v748_v25, %v4202_v1  ;;  %v746_v32 = vadd.f32 1.0, %v2860_v26  ;;  %1336 = vmatpush.bf16.msra.mxu0 %v2895_v0  ;;  %v663_v56 = vmul.f32 %v662_v4, %v638_v36  ;;  %v2939_v63 = vor.u32 %v3668_v6, %v2936_v10  ;;  %v3660_v18 = vld [vmem:[#allocation2 + $0x44] sm:$0xf]  ;;  %v3048_v25 = vld [vmem:[#allocation2 + $0x170] sm:$0xf0] }
  0xd2   : > { %v753_v37 = vmul.f32 %v749_v28, %v574_v43  ;;  %1349 = vmatpush.bf16.msra.mxu1 %v3023_v30  ;;  %v3083_v38 = vor.u32 %v3704_v12, %v3080_v13  ;;  %v2923_v17 = vor.u32 %v3664_v14, %v2920_v39  ;;  %v2904_v43 = vld [vmem:[#allocation2 + $0x50] sm:$0xf0]  ;;  %v755_v55 = vld [vmem:[%s4642_s4] sm:$0xff]  ;;  %v3067_v20 = vor.u32 %v3700_v15, %v3064_v16  ;;  %v2976_v41 = vld [vmem:[#allocation2 + $0xd8] sm:$0xf0] }
  0xd3   : > { %v4289_v46 = vpack.c.bf16 %v752_v31, %v752_v31  ;;  %v750_v1 = vmul.f32 %v746_v32, %v4205_v2  ;;  %v3007_v2 = vor.u32 %v3687_v50, %v3006_v45  ;;  %v2861_v58 = vclamps-f32 %v663_v56, 1.0  ;;  %758 = vperm.xlu2 %3879, %v755_v55   ;;  %v3696_v21 = vld [vmem:[#allocation2 + $0x164] sm:$0xf]  ;;  %v2888_v27 = vld [vmem:[#allocation2 + $0x30] sm:$0xf0] }
  0xd4   : > { %v4298_v44 = vpack.c.bf16 %v753_v37, %v753_v37  ;;  %v2907_v7 = vor.u32 %v3660_v18, %v2904_v43  ;;  %v3656_v26 = vld [vmem:[#allocation2 + $0x24] sm:$0xf]  ;;  %v3051_v23 = vor.u32 %v3696_v21, %v3048_v25  ;;  %v2872_v30 = vld [vmem:[#allocation2 + $0x10] sm:$0xf0]  ;;  %v3681_v31 = vld [vmem:[#allocation2 + $0xec] sm:$0xf] }
  0xd5   : > { %779 = vmatpush.msra.mxu2 %v750_v1  ;;  %1286 = vmatmul.bf16.vlgmr.msrb.gmra.mxu0 %v4289_v46  ;;  %v747_v54 = vadd.f32 1.0, %v2861_v58  ;;  %v3692_v8 = vld [vmem:[#allocation2 + $0x144] sm:$0xf]  ;;  %v2891_v28 = vor.u32 %v3656_v26, %v2888_v27  ;;  %v2992_v32 = vld [vmem:[#allocation2 + $0xf8] sm:$0xf0] }
  0xd6   : > { %2864 = vmatmul.msk.f32.vlgmr.msra.gmra.mxu2 %vm518_vm0, %v754_v48  ;;  %1299 = vmatmul.bf16.vlgmr.msrb.gmra.mxu1 %v4298_v44  ;;  %v3652_v0 = vld [vmem:[#allocation2 + $0x4] sm:$0xf]  ;;  %v3035_v34 = vor.u32 %v3692_v8, %v3032_v29  ;;  %v3016_v36 = vld [vmem:[#allocation2 + $0x130] sm:$0xf0]  ;;  %v2995_v37 = vor.u32 %v3681_v31, %v2992_v32  ;;  %v3713_v47 = vld [vmem:[#allocation2 + $0x1ec] sm:$0xf] }
  0xd7   : > { %1304 = vmatpush.bf16.msrb.mxu2 %v2987_v40  ;;  %1337 = vmatpush.bf16.msra.mxu0 %v2879_v49  ;;  %v751_v62 = vmul.f32 %v747_v54, %v572_v61  ;;  %v2875_v19 = vor.u32 %v3652_v0, %v2872_v30  ;;  %v3688_v35 = vld [vmem:[#allocation2 + $0x124] sm:$0xf]  ;;  %v3677_v40 = vld [vmem:[#allocation2 + $0xcc] sm:$0xf]  ;;  %v3000_v1 = vld [vmem:[#allocation2 + $0x110] sm:$0xf0] }
  0xd8   : > { %1350 = vmatpush.bf16.msra.mxu1 %v3007_v2  ;;  %v3019_v42 = vor.u32 %v3688_v35, %v3016_v36  ;;  %v3684_v45 = vld [vmem:[#allocation2 + $0x104] sm:$0xf]  ;;  %v3120_v49 = vld [vmem:[#allocation2 + $0x1f8] sm:$0xf0]  ;;  %v3673_v50 = vld [vmem:[#allocation2 + $0xac] sm:$0xf] }
  0xd9   : > { %799 = vmatpush.msra.mxu3 %v751_v62  ;;  %v2960_v4 = vld [vmem:[#allocation2 + $0xb8] sm:$0xf0]  ;;  %v3003_v51 = vor.u32 %v3684_v45, %v3000_v1  ;;  %v3123_v52 = vor.u32 %v3713_v47, %v3120_v49  ;;  %v3709_v2 = vld [vmem:[#allocation2 + $0x1cc] sm:$0xf]  ;;  %v1521_v8 = vld [vmem:[%s4646_s8] sm:$0xff] }
  0xda   : > { %2865 = vmatmul.msk.f32.vlgmr.msra.gmra.mxu3 %vm518_vm0, %v754_v48  ;;  %v2979_v48 = vor.u32 %v3677_v40, %v2976_v41  ;;  %v2963_v56 = vor.u32 %v3673_v50, %v2960_v4  ;;  %v3104_v58 = vld [vmem:[#allocation2 + $0x1d8] sm:$0xf0]  ;;  %v3669_v9 = vld [vmem:[#allocation2 + $0x8c] sm:$0xf]  ;;  %1524 = vperm.xlu1 %3878, %v1521_v8   ;;  %v1383_v0 = vld [vmem:[%s4644_s6] sm:$0xff] }
  0xdb   : > { %1305 = vmatpush.bf16.msrb.mxu2 %v2971_v59  ;;  %1317 = vmatpush.bf16.msrb.mxu3 %v3115_v22  ;;  %v2944_v59 = vld [vmem:[#allocation2 + $0x98] sm:$0xf0]  ;;  %v3107_v60 = vor.u32 %v3709_v2, %v3104_v58  ;;  %v3705_v53 = vld [vmem:[#allocation2 + $0x1ac] sm:$0xf]  ;;  %v1520_v35 = vld [vmem:[%s4645_s7] sm:$0xff] }
  0xdc   : > { %v2947_v57 = vor.u32 %v3669_v9, %v2944_v59  ;;  %v3088_v61 = vld [vmem:[#allocation2 + $0x1b8] sm:$0xf0]  ;;  %v3665_v54 = vld [vmem:[#allocation2 + $0x6c] sm:$0xf]  ;;  %v3230_v9 = vld [vmem:[#allocation4 + $0xc0] sm:$0xf] }
  0xdd   : > { %v2928_v62 = vld [vmem:[#allocation2 + $0x78] sm:$0xf0]  ;;  %v3091_v22 = vor.u32 %v3705_v53, %v3088_v61  ;;  %v3701_v3 = vld [vmem:[#allocation2 + $0x18c] sm:$0xf]  ;;  %v3742_v59 = vld [vmem:[#allocation4 + $0xcc] sm:$0xf0] }
  0xde   : > { %v3072_v24 = vld [vmem:[#allocation2 + $0x198] sm:$0xf0]  ;;  %v3661_v6 = vld [vmem:[#allocation2 + $0x4c] sm:$0xf]  ;;  %v3738_v61 = vld [vmem:[#allocation4 + $0xac] sm:$0xf0] }
  0xdf   : > { %1306 = vmatpush.bf16.msrb.mxu2 %v2955_v5  ;;  %1318 = vmatpush.bf16.msrb.mxu3 %v3099_v11  ;;  %v2931_v5 = vor.u32 %v3665_v54, %v2928_v62  ;;  %v2912_v10 = vld [vmem:[#allocation2 + $0x58] sm:$0xf0]  ;;  %v3075_v11 = vor.u32 %v3701_v3, %v3072_v24  ;;  %v3697_v12 = vld [vmem:[#allocation2 + $0x16c] sm:$0xf]  ;;  %v3198_v62 = vld [vmem:[#allocation4 + $0x80] sm:$0xf] }
  0xe0   : > { %v3056_v13 = vld [vmem:[#allocation2 + $0x178] sm:$0xf0]  ;;  %v3657_v14 = vld [vmem:[#allocation2 + $0x2c] sm:$0xf]  ;;  %v3730_v24 = vld [vmem:[#allocation4 + $0x6c] sm:$0xf0] }
  0xe1   : > { %v2896_v39 = vld [vmem:[#allocation2 + $0x38] sm:$0xf0]  ;;  %v3693_v15 = vld [vmem:[#allocation2 + $0x14c] sm:$0xf]  ;;  %v3718_v8 = vld [vmem:[#allocation4 + $0xc] sm:$0xf0] }
  0xe2   : > { %v2899_v16 = vor.u32 %v3657_v14, %v2896_v39  ;;  %v3653_v18 = vld [vmem:[#allocation2 + $0xc] sm:$0xf]  ;;  %v2880_v43 = vld [vmem:[#allocation2 + $0x18] sm:$0xf0]  ;;  %1386 = vperm.xlu1 %3878, %v1383_v0  }
  0xe3   : > { %1307 = vmatpush.bf16.msrb.mxu2 %v2939_v63  ;;  %1319 = vmatpush.bf16.msrb.mxu3 %v3083_v38  ;;  %v2915_v63 = vor.u32 %v3661_v6, %v2912_v10  ;;  %v3059_v38 = vor.u32 %v3697_v12, %v3056_v13  ;;  %v3689_v21 = vld [vmem:[#allocation2 + $0x12c] sm:$0xf]  ;;  %v3008_v27 = vld [vmem:[#allocation2 + $0x118] sm:$0xf0]  ;;  %v3726_v13 = vld [vmem:[#allocation4 + $0x4c] sm:$0xf0] }
  0xe4   : > { %v3685_v26 = vld [vmem:[#allocation2 + $0x10c] sm:$0xf] }
  0xe5   : > { %1338 = vmatmul.bf16.vlgmr.msra.gmra.mxu0 %v4289_v46 }
  0xe6   : > { %1351 = vmatmul.bf16.vlgmr.msra.gmra.mxu1 %v4298_v44 }
  0xe7   : > { %1308 = vmatpush.bf16.msrb.mxu2 %v2923_v17  ;;  %1320 = vmatpush.bf16.msrb.mxu3 %v3067_v20  ;;  %v3040_v17 = vld [vmem:[#allocation2 + $0x158] sm:$0xf0]  ;;  %v2883_v20 = vor.u32 %v3653_v18, %v2880_v43  ;;  %v3150_v18 = vld [vmem:[#allocation4 + $0x20] sm:$0xf]  ;;  %v3722_v43 = vld [vmem:[#allocation4 + $0x2c] sm:$0xf0] }
  0xe8   : > { %v3043_v55 = vor.u32 %v3693_v15, %v3040_v17  ;;  %v3810_v15 = vld [vmem:[#allocation4 + $0x2ec] sm:$0xf0] }
  0xeb   : > { %1309 = vmatpush.bf16.msrb.mxu2 %v2907_v7  ;;  %1321 = vmatpush.bf16.msrb.mxu3 %v3051_v23  ;;  %v3024_v7 = vld [vmem:[#allocation2 + $0x138] sm:$0xf0]  ;;  %v3011_v23 = vor.u32 %v3685_v26, %v3008_v27 }
  0xec   : > { %v3027_v25 = vor.u32 %v3689_v21, %v3024_v7  ;;  %v3486_v21 = vld [vmem:[#allocation4 + $0x2c0] sm:$0xf]  ;;  %v3806_v7 = vld [vmem:[#allocation4 + $0x2cc] sm:$0xf0] }
  0xef   : > { %1310 = vmatpush.bf16.msrb.mxu2 %v2891_v28  ;;  %1322 = vmatpush.bf16.msrb.mxu3 %v3035_v34 }
  0xf3   : > { %1311 = vmatpush.bf16.msrb.mxu2 %v2875_v19  ;;  %1323 = vmatpush.bf16.msrb.mxu3 %v3019_v42 }
  0xf6   : > { %1312 = vmatmul.bf16.vlgmr.msrb.gmra.mxu2 %v4289_v46 }
  0xf7   : > { %1356 = vmatpush.bf16.msra.mxu2 %v2995_v37  ;;  %1324 = vmatpush.bf16.msrb.mxu3 %v3003_v51  ;;  %v3246_v51 = vld [vmem:[#allocation4 + $0xe0] sm:$0xf] }
  0xfa   : > { %1325 = vmatmul.bf16.vlgmr.msrb.gmra.mxu3 %v4298_v44 }
  0xfb   : > { %1357 = vmatpush.bf16.msra.mxu2 %v2979_v48  ;;  %1369 = vmatpush.bf16.msra.mxu3 %v3123_v52  ;;  %v3746_v52 = vld [vmem:[#allocation4 + $0xec] sm:$0xf0] }
  0xff   : > { %1358 = vmatpush.bf16.msra.mxu2 %v2963_v56  ;;  %1370 = vmatpush.bf16.msra.mxu3 %v3107_v60  ;;  %v3247_v56 = vor.u32 %v3746_v52, %v3246_v51  ;;  %v3231_v60 = vor.u32 %v3742_v59, %v3230_v9 }
 0x103   : > { %1359 = vmatpush.bf16.msra.mxu2 %v2947_v57  ;;  %1371 = vmatpush.bf16.msra.mxu3 %v3091_v22  ;;  %v3214_v57 = vld [vmem:[#allocation4 + $0xa0] sm:$0xf]  ;;  %v3734_v22 = vld [vmem:[#allocation4 + $0x8c] sm:$0xf0] }
 0x104   : > { %v3215_v54 = vor.u32 %v3738_v61, %v3214_v57  ;;  %v3199_v3 = vor.u32 %v3734_v22, %v3198_v62  ;;  %v3342_v57 = vld [vmem:[#allocation4 + $0x1a0] sm:$0xf]  ;;  %v3770_v61 = vld [vmem:[#allocation4 + $0x1ac] sm:$0xf0]  ;;  %v3736_v62 = vld [vmem:[#allocation4 + $0xa4] sm:$0xf] }
 0x105   : > { %v3216_v22 = vld [vmem:[#allocation4 + $0xb0] sm:$0xf0] }
 0x107   : > { %1360 = vmatpush.bf16.msra.mxu2 %v2931_v5  ;;  %1372 = vmatpush.bf16.msra.mxu3 %v3075_v11  ;;  %v3182_v5 = vld [vmem:[#allocation4 + $0x60] sm:$0xf] }
 0x108   : > { %v3183_v10 = vor.u32 %v3730_v24, %v3182_v5  ;;  %v3219_v24 = vor.u32 %v3736_v62, %v3216_v22  ;;  %v3278_v62 = vld [vmem:[#allocation4 + $0x120] sm:$0xf] }
 0x10b   : > { %1361 = vmatpush.bf16.msra.mxu2 %v2915_v63  ;;  %1373 = vmatpush.bf16.msra.mxu3 %v3059_v38  ;;  %v3166_v63 = vld [vmem:[#allocation4 + $0x40] sm:$0xf] }
 0x10c   : > { %v3167_v14 = vor.u32 %v3726_v13, %v3166_v63  ;;  %v3502_v38 = vld [vmem:[#allocation4 + $0x2e0] sm:$0xf] }
 0x10f   : > { %1362 = vmatpush.bf16.msra.mxu2 %v2899_v16  ;;  %1374 = vmatpush.bf16.msra.mxu3 %v3043_v55  ;;  %v3503_v16 = vor.u32 %v3810_v15, %v3502_v38  ;;  %v3151_v55 = vor.u32 %v3722_v43, %v3150_v18  ;;  %v3766_v38 = vld [vmem:[#allocation4 + $0x18c] sm:$0xf0] }
 0x113   : > { %1363 = vmatpush.bf16.msra.mxu2 %v2883_v20  ;;  %1375 = vmatpush.bf16.msra.mxu3 %v3027_v25  ;;  %v3487_v25 = vor.u32 %v3806_v7, %v3486_v21  ;;  %v3422_v7 = vld [vmem:[#allocation4 + $0x240] sm:$0xf] }
 0x116   : > { %1364 = vmatmul.bf16.vlgmr.msra.gmra.mxu2 %v4289_v46  ;;  %v1382_v46 = vld [vmem:[%s4643_s5] sm:$0xff] }
 0x117   : > { %1376 = vmatpush.bf16.msra.mxu3 %v3011_v23  ;;  %v3134_v23 = vld [vmem:[#allocation4] sm:$0xf] }
 0x11a   : > { %1377 = vmatmul.bf16.vlgmr.msra.gmra.mxu3 %v4298_v44 }
 0x14c   : > { %v4336_v53 = vpop.permute.xlu1 %1524 }
 0x152   : > { %v1287_v28 = vpop.f32.mrf.mxu0 }
 0x153   : > { %v1300_v29 = vpop.f32.mrf.mxu1 }
 0x154   : > { %v1301_v30 = vadd.f32 %v1300_v29, %v1287_v28  ;;  %v4338_v6 = vpop.permute.xlu1 %1386  ;;  %v3374_v28 = vld [vmem:[#allocation4 + $0x1e0] sm:$0xf]  ;;  %v3778_v29 = vld [vmem:[#allocation4 + $0x1ec] sm:$0xf0] }
 0x156   : > { %1407 = vmatpush.msrb.mxu0 %v1301_v30 }
 0x157   : > { %3124 = vmatmul.msk.f32.vlgmr.msrb.gmra.mxu0 %vm518_vm0, %v1382_v46 }
 0x158   : > { %2430 = vmatpush.bf16.msra.mxu0 %v3247_v56 }
 0x159   : > { %v4330_v40 = vpop.f32.mrf.mxu2 }
 0x15a   : > { %v1289_v44 = vpop.f32.mrf.mxu0 }
 0x15b   : > { %v1302_v31 = vpop.f32.mrf.mxu1  ;;  %v3375_v44 = vor.u32 %v3778_v29, %v3374_v28  ;;  %v3310_v28 = vld [vmem:[#allocation4 + $0x160] sm:$0xf]  ;;  %v3762_v29 = vld [vmem:[#allocation4 + $0x16c] sm:$0xf0] }
 0x15c   : > { %2431 = vmatpush.bf16.msra.mxu0 %v3231_v60  ;;  %v3744_v31 = vld [vmem:[#allocation4 + $0xe4] sm:$0xf] }
 0x15d   : > { %v4332_v41 = vpop.f32.mrf.mxu3 }
 0x160   : > { %2432 = vmatpush.bf16.msra.mxu0 %v3215_v54  ;;  %v3343_v54 = vor.u32 %v3770_v61, %v3342_v57  ;;  %v3808_v61 = vld [vmem:[#allocation4 + $0x2e4] sm:$0xf] }
 0x162   : > { %v1339_v32 = vpop.f32.mrf.mxu0 }
 0x163   : > { %v1352_v34 = vpop.f32.mrf.mxu1 }
 0x164   : > { %v1353_v19 = vadd.f32 %v1352_v34, %v1339_v32  ;;  %2433 = vmatpush.bf16.msra.mxu0 %v3199_v3  ;;  %v3248_v32 = vld [vmem:[#allocation4 + $0xf0] sm:$0xf0]  ;;  %v3470_v34 = vld [vmem:[#allocation4 + $0x2a0] sm:$0xf] }
 0x166   : > { %1545 = vmatpush.msrb.mxu2 %v1353_v19  ;;  %v3802_v19 = vld [vmem:[#allocation4 + $0x2ac] sm:$0xf0] }
 0x167   : > { %3128 = vmatmul.msk.f32.vlgmr.msrb.gmra.mxu2 %vm518_vm0, %v1520_v35 }
 0x168   : > { %2434 = vmatpush.bf16.msra.mxu0 %v3183_v10  ;;  %2456 = vmatpush.bf16.msra.mxu2 %v3503_v16  ;;  %v3438_v10 = vld [vmem:[#allocation4 + $0x260] sm:$0xf]  ;;  %v3732_v16 = vld [vmem:[#allocation4 + $0x84] sm:$0xf] }
 0x16a   : > { %v1341_v36 = vpop.f32.mrf.mxu0 }
 0x16b   : > { %v1354_v37 = vpop.f32.mrf.mxu1 }
 0x16c   : > { %2435 = vmatpush.bf16.msra.mxu0 %v3167_v14  ;;  %2457 = vmatpush.bf16.msra.mxu2 %v3487_v25  ;;  %v3326_v14 = vld [vmem:[#allocation4 + $0x180] sm:$0xf] }
 0x16d   : > { %v3327_v15 = vor.u32 %v3766_v38, %v3326_v14 }
 0x170   : > { %2436 = vmatpush.bf16.msra.mxu0 %v3151_v55 }
 0x179   : > { %v1313_v42 = vpop.f32.mrf.mxu2 }
 0x17d   : > { %v1326_v45 = vpop.f32.mrf.mxu3 }
 0x17e   : > { %v1327_v47 = vadd.f32 %v1326_v45, %v1313_v42  ;;  %v3251_v42 = vor.u32 %v3744_v31, %v3248_v32  ;;  %v3358_v45 = vld [vmem:[#allocation4 + $0x1c0] sm:$0xf] }
 0x180   : > { %1427 = vmatpush.msrb.mxu1 %v1327_v47  ;;  %v3471_v47 = vor.u32 %v3802_v19, %v3470_v34  ;;  %v3406_v19 = vld [vmem:[#allocation4 + $0x220] sm:$0xf] }
 0x181   : > { %v1315_v1 = vpop.f32.mrf.mxu2  ;;  %3125 = vmatmul.msk.f32.vlgmr.msrb.gmra.mxu1 %vm518_vm0, %v1382_v46  ;;  %v3135_v46 = vor.u32 %v3718_v8, %v3134_v23 }
 0x182   : > { %2443 = vmatpush.bf16.msra.mxu1 %v3375_v44  ;;  %v3774_v1 = vld [vmem:[#allocation4 + $0x1cc] sm:$0xf0]  ;;  %2458 = vmatpush.bf16.msra.mxu2 %v3471_v47  ;;  %v3184_v44 = vld [vmem:[#allocation4 + $0x70] sm:$0xf0] }
 0x183   : > { %2437 = vmatpush.bf16.msra.mxu0 %v3135_v46  ;;  %v3728_v46 = vld [vmem:[#allocation4 + $0x64] sm:$0xf] }
 0x184   : > { %v3187_v34 = vor.u32 %v3728_v46, %v3184_v44  ;;  %v3776_v46 = vld [vmem:[#allocation4 + $0x1e4] sm:$0xf] }
 0x185   : > { %v1328_v48 = vpop.f32.mrf.mxu3 }
 0x186   : > { %v3359_v48 = vor.u32 %v3774_v1, %v3358_v45  ;;  %v3294_v45 = vld [vmem:[#allocation4 + $0x140] sm:$0xf]  ;;  %v3758_v1 = vld [vmem:[#allocation4 + $0x14c] sm:$0xf0] }
 0x187   : > { %2482 = vmatpush.bf16.msrb.mxu0 %v3251_v42  ;;  %v3786_v42 = vld [vmem:[#allocation4 + $0x22c] sm:$0xf0] }
 0x188   : > { %2444 = vmatpush.bf16.msra.mxu1 %v3359_v48  ;;  %v3407_v48 = vor.u32 %v3786_v42, %v3406_v19 }
 0x18c   : > { %2445 = vmatpush.bf16.msra.mxu1 %v3343_v54  ;;  %v3504_v54 = vld [vmem:[#allocation4 + $0x2f0] sm:$0xf0] }
 0x190   : > { %2446 = vmatpush.bf16.msra.mxu1 %v3327_v15 }
 0x199   : > { %v1365_v49 = vpop.f32.mrf.mxu2 }
 0x19d   : > { %v1378_v50 = vpop.f32.mrf.mxu3 }
 0x19e   : > { %v1379_v2 = vadd.f32 %v1378_v50, %v1365_v49  ;;  %v3740_v49 = vld [vmem:[#allocation4 + $0xc4] sm:$0xf]  ;;  %v3232_v50 = vld [vmem:[#allocation4 + $0xd0] sm:$0xf0] }
 0x19f   : > { %v3235_v52 = vor.u32 %v3740_v49, %v3232_v50  ;;  %v3295_v49 = vor.u32 %v3758_v1, %v3294_v45  ;;  %v3724_v50 = vld [vmem:[#allocation4 + $0x44] sm:$0xf] }
 0x1a0   : > { %1565 = vmatpush.msrb.mxu3 %v1379_v2  ;;  %v3454_v2 = vld [vmem:[#allocation4 + $0x280] sm:$0xf] }
 0x1a1   : > { %v1367_v4 = vpop.f32.mrf.mxu2  ;;  %3129 = vmatmul.msk.f32.vlgmr.msrb.gmra.mxu3 %vm518_vm0, %v1520_v35  ;;  %v4353_v35 = vpop.permute.xlu2 %758  ;;  %2483 = vmatpush.bf16.msrb.mxu0 %v3235_v52 }
 0x1a2   : > { %v4359_v56 = vadd.f32 %v4330_v40, %v4353_v35 }
 0x1a4   : > { %v4365_v40 = vmul.f32 %v4359_v56, %v4114_v33 }
 0x1a5   : > { %v1380_v58 = vpop.f32.mrf.mxu3  ;;  %2484 = vmatpush.bf16.msrb.mxu0 %v3219_v24 }
 0x1a6   : > { %v3798_v58 = vld [vmem:[#allocation4 + $0x28c] sm:$0xf0]  ;;  %v808_v25 = vmul.f32 %v4365_v40, %v4365_v40 }
 0x1a7   : > { %v3455_v60 = vor.u32 %v3798_v58, %v3454_v2  ;;  %v3390_v2 = vld [vmem:[#allocation4 + $0x200] sm:$0xf]  ;;  %v3782_v58 = vld [vmem:[#allocation4 + $0x20c] sm:$0xf0] }
 0x1a8   : > { %v3391_v57 = vor.u32 %v3782_v58, %v3390_v2  ;;  %v3772_v2 = vld [vmem:[#allocation4 + $0x1c4] sm:$0xf] }
 0x1a9   : > { %2459 = vmatpush.bf16.msra.mxu2 %v3455_v60 }
 0x1d4   : > { %v1409_v11 = vpop.f32.mrf.mxu0 }
 0x1d5   : > { %v4341_v12 = vadd.f32 %v1409_v11, %v4338_v6  ;;  %v3794_v11 = vld [vmem:[#allocation4 + $0x26c] sm:$0xf0] }
 0x1d6   : > { %v3439_v13 = vor.u32 %v3794_v11, %v3438_v10 }
 0x1d7   : > { %v4345_v39 = vmul.f32 %v4341_v12, %v4114_v33 }
 0x1d8   : > { %2460 = vmatpush.bf16.msra.mxu2 %v3439_v13  ;;  %v3152_v13 = vld [vmem:[#allocation4 + $0x30] sm:$0xf0] }
 0x1d9   : > { %v1436_v17 = vmul.f32 %v4345_v39, %v4345_v39 }
 0x1db   : > { %v4349_v20 = vmin.f32 %v1436_v17, 16.0  ;;  %v3200_v17 = vld [vmem:[#allocation4 + $0x90] sm:$0xf0] }
 0x1dc   : > { %v3203_v21 = vor.u32 %v3732_v16, %v3200_v17  ;;  %v3804_v17 = vld [vmem:[#allocation4 + $0x2c4] sm:$0xf] }
 0x1dd   : > { %v1438_v26 = vmul.f32 2.1237322e-06, %v4349_v20  ;;  %v1449_v27 = vmul.f32 3.8918573e-05, %v4349_v20 }
 0x1de   : > { %2485 = vmatpush.bf16.msrb.mxu0 %v3203_v21 }
 0x1df   : > { %v1439_v0 = vadd.f32 0.00028619796, %v1438_v26  ;;  %v1450_v30 = vadd.f32 0.001143296, %v1449_v27  ;;  %v3790_v27 = vld [vmem:[#allocation4 + $0x24c] sm:$0xf0] }
 0x1e0   : > { %v3423_v8 = vor.u32 %v3790_v27, %v3422_v7  ;;  %v3262_v7 = vld [vmem:[#allocation4 + $0x100] sm:$0xf] }
 0x1e1   : > { %v1440_v36 = vmul.f32 %v1439_v0, %v4349_v20  ;;  %v1451_v37 = vmul.f32 %v1450_v30, %v4349_v20  ;;  %v3311_v30 = vor.u32 %v3762_v29, %v3310_v28  ;;  %v3716_v29 = vld [vmem:[#allocation4 + $0x4] sm:$0xf] }
 0x1e2   : > { %2461 = vmatpush.bf16.msra.mxu2 %v3423_v8  ;;  %2486 = vmatpush.bf16.msrb.mxu0 %v3187_v34 }
 0x1e3   : > { %v1441_v4 = vadd.f32 0.0036580483, %v1440_v36  ;;  %v1452_v51 = vadd.f32 0.014752088, %v1451_v37  ;;  %v4381_v36 = vmin.f32 %v808_v25, 16.0  ;;  %2447 = vmatpush.bf16.msra.mxu1 %v3311_v30 }
 0x1e4   : > { %v3750_v25 = vld [vmem:[#allocation4 + $0x10c] sm:$0xf0]  ;;  %v3136_v30 = vld [vmem:[#allocation4 + $0x10] sm:$0xf0] }
 0x1e5   : > { %v1442_v9 = vmul.f32 %v1441_v4, %v4349_v20  ;;  %v1453_v59 = vmul.f32 %v1452_v51, %v4349_v20  ;;  %v3168_v4 = vld [vmem:[#allocation4 + $0x50] sm:$0xf0]  ;;  %v3263_v28 = vor.u32 %v3750_v25, %v3262_v7  ;;  %v3139_v19 = vor.u32 %v3716_v29, %v3136_v30  ;;  %v3747_v7 = vld [vmem:[#allocation4 + $0xf4] sm:$0xf0] }
 0x1e6   : > { %v3171_v52 = vor.u32 %v3724_v50, %v3168_v4  ;;  %2462 = vmatpush.bf16.msra.mxu2 %v3407_v48  ;;  %v3472_v50 = vld [vmem:[#allocation4 + $0x2b0] sm:$0xf0] }
 0x1e7   : > { %v1443_v3 = vadd.f32 0.05243302, %v1442_v9  ;;  %v1454_v5 = vadd.f32 0.112945676, %v1453_v59  ;;  %v4390_v9 = vmul.f32 3.8918573e-05, %v4381_v36  ;;  %2448 = vmatpush.bf16.msra.mxu1 %v3295_v49 }
 0x1e8   : > { %2487 = vmatpush.bf16.msrb.mxu0 %v3171_v52  ;;  %v3800_v49 = vld [vmem:[#allocation4 + $0x2a4] sm:$0xf]  ;;  %v3328_v29 = vld [vmem:[#allocation4 + $0x190] sm:$0xf0] }
 0x1e9   : > { %v1455_v63 = vmul.f32 %v1454_v5, %v4349_v20  ;;  %v1444_v18 = vmul.f32 %v1443_v3, %v4349_v20  ;;  %v3754_v5 = vld [vmem:[#allocation4 + $0x12c] sm:$0xf0]  ;;  %v3475_v52 = vor.u32 %v3800_v49, %v3472_v50 }
 0x1ea   : > { %v1547_v55 = vpop.f32.mrf.mxu2  ;;  %v3279_v11 = vor.u32 %v3754_v5, %v3278_v62  ;;  %2463 = vmatpush.bf16.msra.mxu2 %v3391_v57  ;;  %v3630_v57 = vld [vmem:[#allocation4 + $0x3e0] sm:$0xf]  ;;  %v3834_v50 = vld [vmem:[#allocation4 + $0x3ac] sm:$0xf0] }
 0x1eb   : > { %v1456_v43 = vadd.f32 0.4994258, %v1455_v63  ;;  %v4372_v26 = vadd.f32 %v1547_v55, %v4336_v53  ;;  %v1445_v31 = vadd.f32 0.18741608, %v1444_v18  ;;  %v3720_v63 = vld [vmem:[#allocation4 + $0x24] sm:$0xf] }
 0x1ec   : > { %v3488_v18 = vld [vmem:[#allocation4 + $0x2d0] sm:$0xf0]  ;;  %2449 = vmatpush.bf16.msra.mxu1 %v3279_v11  ;;  %v3155_v55 = vor.u32 %v3720_v63, %v3152_v13  ;;  %v1432_v13 = vmul.f32 0.5, %v4341_v12  ;;  %v3614_v12 = vld [vmem:[#allocation4 + $0x3c0] sm:$0xf] }
 0x1ed   : > { %v1457_v23 = vmul.f32 %v1456_v43, %v4349_v20  ;;  %v4377_v0 = vmul.f32 %v4372_v26, %v4114_v33  ;;  %v1446_v51 = vmul.f32 %v1445_v31, %v4349_v20  ;;  %v3507_v20 = vor.u32 %v3808_v61, %v3504_v54  ;;  %v3842_v61 = vld [vmem:[#allocation4 + $0x3ec] sm:$0xf0]  ;;  %v3796_v54 = vld [vmem:[#allocation4 + $0x284] sm:$0xf] }
 0x1ee   : > { %v3491_v21 = vor.u32 %v3804_v17, %v3488_v18  ;;  %2488 = vmatpush.bf16.msrb.mxu0 %v3155_v55  ;;  %v3838_v55 = vld [vmem:[#allocation4 + $0x3cc] sm:$0xf0] }
 0x1ef   : > { %v4379_v32 = vadd.f32 1.0, %v1457_v23  ;;  %v1574_v37 = vmul.f32 %v4377_v0, %v4377_v0  ;;  %v1447_v10 = vadd.f32 1.1283791, %v1446_v51  ;;  %2508 = vmatpush.bf16.msrb.mxu2 %v3507_v20  ;;  %v822_v20 = vadd.f32 0.001143296, %v4390_v9 }
 0x1f0   : > { %2450 = vmatpush.bf16.msra.mxu1 %v3263_v28  ;;  %v3615_v25 = vor.u32 %v3838_v55, %v3614_v12  ;;  %v3764_v28 = vld [vmem:[#allocation4 + $0x184] sm:$0xf]  ;;  %v3735_v12 = vld [vmem:[#allocation4 + $0x94] sm:$0xf0] }
 0x1f1   : > { %3890 = vrcp.f32 %v4379_v32  ;;  %v4386_v47 = vmin.f32 %v1574_v37, 16.0  ;;  %vm1464_vm3 = vweird.f32 %v4379_v32  ;;  %v1468_v38 = vand.u32 2147483647, %v4379_v32  ;;  %v3376_v37 = vld [vmem:[#allocation4 + $0x1f0] sm:$0xf0] }
 0x1f2   : > { %v1470_v43 = vand.u32 2147483648, %v4379_v32  ;;  %v1448_v42 = vmul.f32 %v1447_v10, %v4345_v39  ;;  %v3379_v48 = vor.u32 %v3776_v46, %v3376_v37  ;;  %2489 = vmatpush.bf16.msrb.mxu0 %v3139_v19  ;;  %v3360_v39 = vld [vmem:[#allocation4 + $0x1d0] sm:$0xf0]  ;;  %v823_v30 = vmul.f32 %v822_v20, %v4381_v36 }
 0x1f3   : > { %v1576_v59 = vmul.f32 2.1237322e-06, %v4386_v47  ;;  %v1587_v60 = vmul.f32 3.8918573e-05, %v4386_v47  ;;  %2509 = vmatpush.bf16.msrb.mxu2 %v3491_v21  ;;  %vm1469_vm6 = vcmp.eq.f32.partialorder %v1468_v38, 8.507059e+37  ;;  %v3331_v49 = vor.u32 %v3764_v28, %v3328_v29 }
 0x1f4   : > { %v1471_v1 = vor.u32 1.1754944e-38, %v1470_v43  ;;  %2495 = vmatpush.bf16.msrb.mxu1 %v3379_v48  ;;  %v3344_v38 = vld [vmem:[#allocation4 + $0x1b0] sm:$0xf0]  ;;  %v3254_v43 = vld [vmem:[#allocation4 + $0xe8] sm:$0xf] }
 0x1f5   : > { %v1577_v22 = vadd.f32 0.00028619796, %v1576_v59  ;;  %v1588_v3 = vadd.f32 0.001143296, %v1587_v60  ;;  %v3363_v60 = vor.u32 %v3772_v2, %v3360_v39  ;;  %v3255_v37 = vor.u32 %v3747_v7, %v3254_v43  ;;  %v3206_v43 = vld [vmem:[#allocation4 + $0x88] sm:$0xf] }
 0x1f6   : > { %v824_v39 = vadd.f32 0.014752088, %v823_v30  ;;  %v3566_v28 = vld [vmem:[#allocation4 + $0x360] sm:$0xf]  ;;  %v3826_v29 = vld [vmem:[#allocation4 + $0x36c] sm:$0xf0] }
 0x1f7   : > { %v3891_v24 = vpop.eup %3890  ;;  %v1578_v15 = vmul.f32 %v1577_v22, %v4386_v47  ;;  %v1589_v16 = vmul.f32 %v1588_v3, %v4386_v47  ;;  %2510 = vmatpush.bf16.msrb.mxu2 %v3475_v52  ;;  %v3631_v22 = vor.u32 %v3842_v61, %v3630_v57  ;;  %v3456_v3 = vld [vmem:[#allocation4 + $0x290] sm:$0xf0]  ;;  %v3760_v57 = vld [vmem:[#allocation4 + $0x164] sm:$0xf] }
 0x1f8   : > { %v1460_v14 = vmul.f32 %v3891_v24, %v4379_v32  ;;  %vm1465_vm4 = vweird.f32 %v3891_v24  ;;  %v3459_v63 = vor.u32 %v3796_v54, %v3456_v3  ;;  %2496 = vmatpush.bf16.msrb.mxu1 %v3363_v60  ;;  %v3312_v61 = vld [vmem:[#allocation4 + $0x170] sm:$0xf0]  ;;  %v3780_v30 = vld [vmem:[#allocation4 + $0x204] sm:$0xf] }
 0x1f9   : > { %v1579_v23 = vadd.f32 0.0036580483, %v1578_v15  ;;  %v1590_v8 = vadd.f32 0.014752088, %v1589_v16  ;;  %vm4406_vm5 = vmor %vm1464_vm3, %vm1465_vm4  ;;  %2469 = vmatpush.bf16.msra.mxu3 %v3631_v22  ;;  %v3315_v3 = vor.u32 %v3760_v57, %v3312_v61 }
 0x1fa   : > { %v1461_v27 = vsub.f32 1.0, %v1460_v14  ;;  %v3768_v14 = vld [vmem:[#allocation4 + $0x1a4] sm:$0xf] }
 0x1fb   : > { %v1580_v31 = vmul.f32 %v1579_v23, %v4386_v47  ;;  %v1591_v34 = vmul.f32 %v1590_v8, %v4386_v47  ;;  %v3347_v18 = vor.u32 %v3768_v14, %v3344_v38  ;;  %2511 = vmatpush.bf16.msrb.mxu2 %v3459_v63  ;;  %v3440_v8 = vld [vmem:[#allocation4 + $0x270] sm:$0xf0]  ;;  %v3830_v63 = vld [vmem:[#allocation4 + $0x38c] sm:$0xf0] }
 0x1fc   : > { %v1462_v44 = vmul.f32 %v3891_v24, %v1461_v27  ;;  %v3792_v27 = vld [vmem:[#allocation4 + $0x264] sm:$0xf] }
 0x1fd   : > { %v1592_v51 = vadd.f32 0.112945676, %v1591_v34  ;;  %v1581_v58 = vadd.f32 0.05243302, %v1580_v31  ;;  %2497 = vmatpush.bf16.msrb.mxu1 %v3347_v18  ;;  %v3238_v31 = vld [vmem:[#allocation4 + $0xc8] sm:$0xf]  ;;  %2470 = vmatpush.bf16.msra.mxu3 %v3615_v25  ;;  %v3443_v45 = vor.u32 %v3792_v27, %v3440_v8  ;;  %v825_v8 = vmul.f32 %v824_v39, %v4381_v36 }
 0x1fe   : > { %v1463_v4 = vadd.f32 %v3891_v24, %v1462_v44  ;;  %v1429_v11 = vpop.f32.mrf.mxu1  ;;  %v3743_v34 = vld [vmem:[#allocation4 + $0xd4] sm:$0xf0] }
 0x1ff   : > { %v1593_v59 = vmul.f32 %v1592_v51, %v4386_v47  ;;  %v1582_v16 = vmul.f32 %v1581_v58, %v4386_v47  ;;  %v3424_v51 = vld [vmem:[#allocation4 + $0x250] sm:$0xf0]  ;;  %v4438_v58 = vld [vmem:[#allocation4 + $0xb4] sm:$0xf0]  ;;  %2512 = vmatpush.bf16.msrb.mxu2 %v3443_v45 }
 0x200   : > { %v1467_v32 = vsel %vm4406_vm5, %v3891_v24, %v1463_v4  ;;  %v4416_v24 = vadd.f32 %v1429_v11, %v4338_v6  ;;  %v3788_v4 = vld [vmem:[#allocation4 + $0x244] sm:$0xf]  ;;  %v3582_v11 = vld [vmem:[#allocation4 + $0x380] sm:$0xf] }
 0x201   : > { %v1472_v62 = vsel %vm1469_vm6, %v1471_v1, %v1467_v32  ;;  %v1594_v10 = vadd.f32 0.4994258, %v1593_v59  ;;  %v1583_v44 = vadd.f32 0.18741608, %v1582_v16  ;;  %v3598_v1 = vld [vmem:[#allocation4 + $0x3a0] sm:$0xf]  ;;  %v3239_v32 = vor.u32 %v3743_v34, %v3238_v31  ;;  %2498 = vmatpush.bf16.msrb.mxu1 %v3331_v49 }
 0x202   : > { %v1473_v5 = vmul.f32 %v1472_v62, %v1448_v42  ;;  %v4422_v9 = vmul.f32 %v4416_v24, %v4114_v33  ;;  %v4432_v42 = vld [vmem:[#allocation4 + $0xa8] sm:$0xf]  ;;  %v3599_v59 = vor.u32 %v3834_v50, %v3598_v1  ;;  %v3427_v60 = vor.u32 %v3788_v4, %v3424_v51  ;;  %v3408_v16 = vld [vmem:[#allocation4 + $0x230] sm:$0xf0]  ;;  %v3752_v4 = vld [vmem:[#allocation4 + $0x124] sm:$0xf] }
 0x203   : > { %v1595_v17 = vmul.f32 %v1594_v10, %v4386_v47  ;;  %v3223_v10 = vor.u32 %v4438_v58, %v4432_v42  ;;  %v3583_v55 = vor.u32 %v3830_v63, %v3582_v11  ;;  %v3567_v34 = vor.u32 %v3826_v29, %v3566_v28  ;;  %v3280_v51 = vld [vmem:[#allocation4 + $0x130] sm:$0xf0]  ;;  %v3158_v28 = vld [vmem:[#allocation4 + $0x28] sm:$0xf]  ;;  %v3723_v29 = vld [vmem:[#allocation4 + $0x34] sm:$0xf0] }
 0x204   : > { %v3126_v15 = vclamps-f32 %v1473_v5, 1.0  ;;  %v1476_v23 = vmul.f32 %v4422_v9, %v4422_v9  ;;  %v1584_v5 = vmul.f32 %v1583_v44, %v4386_v47  ;;  %2471 = vmatpush.bf16.msra.mxu3 %v3599_v59  ;;  %2513 = vmatpush.bf16.msrb.mxu2 %v3427_v60  ;;  %v3296_v47 = vld [vmem:[#allocation4 + $0x150] sm:$0xf0]  ;;  %v3207_v49 = vor.u32 %v3735_v12, %v3206_v43  ;;  %v3550_v59 = vld [vmem:[#allocation4 + $0x340] sm:$0xf] }
 0x205   : > { %v4424_v21 = vadd.f32 1.0, %v1595_v17  ;;  %v3756_v17 = vld [vmem:[#allocation4 + $0x144] sm:$0xf]  ;;  %2499 = vmatpush.bf16.msrb.mxu1 %v3315_v3  ;;  %v3283_v39 = vor.u32 %v3752_v4, %v3280_v51  ;;  %v3822_v60 = vld [vmem:[#allocation4 + $0x34c] sm:$0xf0]  ;;  %v1570_v12 = vmul.f32 0.5, %v4372_v26 }
 0x206   : > { %v1516_v6 = vadd.f32 1.0, %v3126_v15  ;;  %v4430_v19 = vmin.f32 %v1476_v23, 16.0  ;;  %v3299_v7 = vor.u32 %v3756_v17, %v3296_v47  ;;  %v3264_v3 = vld [vmem:[#allocation4 + $0x110] sm:$0xf0]  ;;  %v3840_v26 = vld [vmem:[#allocation4 + $0x3e4] sm:$0xf] }
 0x207   : > { %3892 = vrcp.f32 %v4424_v21  ;;  %v1606_v54 = vand.u32 2147483647, %v4424_v21  ;;  %vm1602_vm7 = vweird.f32 %v4424_v21  ;;  %v1608_v18 = vand.u32 2147483648, %v4424_v21  ;;  %v3807_v4 = vld [vmem:[#allocation4 + $0x2d4] sm:$0xf0] }
 0x208   : > { %v1518_v46 = vmul.f32 %v1516_v6, %v1432_v13  ;;  %v1478_v52 = vmul.f32 2.1237322e-06, %v4430_v19  ;;  %v1489_v2 = vmul.f32 3.8918573e-05, %v4430_v19  ;;  %v3784_v13 = vld [vmem:[#allocation4 + $0x224] sm:$0xf]  ;;  %2472 = vmatpush.bf16.msra.mxu3 %v3583_v55 }
 0x209   : > { %v3411_v6 = vor.u32 %v3784_v13, %v3408_v16  ;;  %vm4465_vm10 = vcmp.eq.f32.partialorder %v1606_v54, 8.507059e+37  ;;  %v1609_v1 = vor.u32 1.1754944e-38, %v1608_v18  ;;  %2500 = vmatpush.bf16.msrb.mxu1 %v3299_v7  ;;  %v3818_v16 = vld [vmem:[#allocation4 + $0x32c] sm:$0xf0]  ;;  %v3510_v55 = vld [vmem:[#allocation4 + $0x2e8] sm:$0xf] }
 0x20a   : > { %v4434_v48 = vpack.c.bf16 %v1518_v46, %v1518_v46  ;;  %v1479_v62 = vadd.f32 0.00028619796, %v1478_v52  ;;  %v1490_v22 = vadd.f32 0.001143296, %v1489_v2  ;;  %v1585_v46 = vadd.f32 1.1283791, %v1584_v5 }
 0x20b   : > { %2514 = vmatpush.bf16.msrb.mxu2 %v3411_v6  ;;  %v826_v5 = vadd.f32 0.112945676, %v825_v8  ;;  %v3518_v8 = vld [vmem:[#allocation4 + $0x300] sm:$0xf] }
 0x20c   : > { %2438 = vmatmul.bf16.vlgmr.msra.gmra.mxu0 %v4434_v48  ;;  %v1480_v38 = vmul.f32 %v1479_v62, %v4430_v19  ;;  %v1491_v15 = vmul.f32 %v1490_v22, %v4430_v19  ;;  %2473 = vmatpush.bf16.msra.mxu3 %v3567_v34  ;;  %v1586_v57 = vmul.f32 %v1585_v46, %v4377_v0  ;;  %v3748_v22 = vld [vmem:[#allocation4 + $0x104] sm:$0xf] }
 0x20d   : > { %2534 = vmatpush.bf16.msra.mxu0 %v3255_v37  ;;  %v4442_v20 = vpop.eup %3892  ;;  %v3392_v37 = vld [vmem:[#allocation4 + $0x210] sm:$0xf0]  ;;  %v3551_v62 = vor.u32 %v3822_v60, %v3550_v59  ;;  %2501 = vmatpush.bf16.msrb.mxu1 %v3283_v39  ;;  %v3267_v11 = vor.u32 %v3748_v22, %v3264_v3  ;;  %v827_v43 = vmul.f32 %v826_v5, %v4381_v36  ;;  %v3256_v39 = vld [vmem:[#allocation4 + $0xf8] sm:$0xf0]  ;;  %v3478_v60 = vld [vmem:[#allocation4 + $0x2a8] sm:$0xf] }
 0x20e   : > { %v1598_v14 = vmul.f32 %v4442_v20, %v4424_v21  ;;  %vm1603_vm8 = vweird.f32 %v4442_v20  ;;  %v1481_v27 = vadd.f32 0.0036580483, %v1480_v38  ;;  %v1492_v23 = vadd.f32 0.014752088, %v1491_v15  ;;  %v3190_v21 = vld [vmem:[#allocation4 + $0x68] sm:$0xf] }
 0x20f   : > { %vm4461_vm9 = vmor %vm1602_vm7, %vm1603_vm8  ;;  %v3395_v50 = vor.u32 %v3780_v30, %v3392_v37  ;;  %v3174_v38 = vld [vmem:[#allocation4 + $0x48] sm:$0xf]  ;;  %v3727_v15 = vld [vmem:[#allocation4 + $0x54] sm:$0xf0]  ;;  %v828_v34 = vadd.f32 0.4994258, %v827_v43 }
 0x210   : > { %v1599_v25 = vsub.f32 1.0, %v1598_v14  ;;  %v1493_v31 = vmul.f32 %v1492_v23, %v4430_v19  ;;  %v1482_v2 = vmul.f32 %v1481_v27, %v4430_v19  ;;  %2474 = vmatpush.bf16.msra.mxu3 %v3551_v62  ;;  %v3175_v27 = vor.u32 %v3727_v15, %v3174_v38  ;;  %v3811_v23 = vld [vmem:[#allocation4 + $0x2f4] sm:$0xf0]  ;;  %v3814_v30 = vld [vmem:[#allocation4 + $0x30c] sm:$0xf0] }
 0x211   : > { %2535 = vmatpush.bf16.msra.mxu0 %v3239_v32  ;;  %v3731_v32 = vld [vmem:[#allocation4 + $0x74] sm:$0xf0]  ;;  %2515 = vmatpush.bf16.msrb.mxu2 %v3395_v50  ;;  %v3511_v37 = vor.u32 %v3811_v23, %v3510_v55  ;;  %v3519_v42 = vor.u32 %v3814_v30, %v3518_v8  ;;  %v3494_v50 = vld [vmem:[#allocation4 + $0x2c8] sm:$0xf]  ;;  %v3828_v23 = vld [vmem:[#allocation4 + $0x384] sm:$0xf] }
 0x212   : > { %v1600_v44 = vmul.f32 %v4442_v20, %v1599_v25  ;;  %v1494_v58 = vadd.f32 0.112945676, %v1493_v31  ;;  %v1483_v13 = vadd.f32 0.05243302, %v1482_v2  ;;  %v3191_v0 = vor.u32 %v3731_v32, %v3190_v21  ;;  %2502 = vmatpush.bf16.msrb.mxu1 %v3267_v11  ;;  %v3719_v2 = vld [vmem:[#allocation4 + $0x14] sm:$0xf0] }
 0x213   : > { %v810_v31 = vmul.f32 2.1237322e-06, %v4381_v36  ;;  %v3745_v21 = vld [vmem:[#allocation4 + $0xec] sm:$0xf]  ;;  %v3616_v32 = vld [vmem:[#allocation4 + $0x3d0] sm:$0xf0]  ;;  %v3495_v59 = vor.u32 %v3807_v4, %v3494_v50 }
 0x214   : > { %v1601_v52 = vadd.f32 %v4442_v20, %v1600_v44  ;;  %v1495_v54 = vmul.f32 %v1494_v58, %v4430_v19  ;;  %v1484_v7 = vmul.f32 %v1483_v13, %v4430_v19  ;;  %v3632_v44 = vld [vmem:[#allocation4 + $0x3f0] sm:$0xf0]  ;;  %v3836_v58 = vld [vmem:[#allocation4 + $0x3c4] sm:$0xf]  ;;  %v3259_v13 = vor.u32 %v3745_v21, %v3256_v39  ;;  %v3799_v55 = vld [vmem:[#allocation4 + $0x294] sm:$0xf0] }
 0x215   : > { %2536 = vmatpush.bf16.msra.mxu0 %v3223_v10  ;;  %v3635_v51 = vor.u32 %v3840_v26, %v3632_v44  ;;  %v811_v62 = vadd.f32 0.00028619796, %v810_v31  ;;  %v3584_v8 = vld [vmem:[#allocation4 + $0x390] sm:$0xf0]  ;;  %v3224_v26 = vld [vmem:[#allocation4 + $0xb8] sm:$0xf0] }
 0x216   : > { %v1605_v61 = vsel %vm4461_vm9, %v4442_v20, %v1601_v52  ;;  %v1496_v14 = vadd.f32 0.4994258, %v1495_v54  ;;  %v3534_v20 = vld [vmem:[#allocation4 + $0x320] sm:$0xf]  ;;  %v3142_v52 = vld [vmem:[#allocation4 + $0x8] sm:$0xf]  ;;  %v3587_v44 = vor.u32 %v3828_v23, %v3584_v8 }
 0x217   : > { %v1610_v10 = vsel %vm4465_vm10, %v1609_v1, %v1605_v61  ;;  %v3535_v18 = vor.u32 %v3818_v16, %v3534_v20  ;;  %v1485_v1 = vadd.f32 0.18741608, %v1484_v7  ;;  %v3619_v61 = vor.u32 %v3836_v58, %v3616_v32  ;;  %v3741_v20 = vld [vmem:[#allocation4 + $0xcc] sm:$0xf]  ;;  %v3824_v21 = vld [vmem:[#allocation4 + $0x364] sm:$0xf] }
 0x218   : > { %v1611_v63 = vmul.f32 %v1610_v10, %v1586_v57  ;;  %v1497_v47 = vmul.f32 %v1496_v14, %v4430_v19  ;;  %v3803_v57 = vld [vmem:[#allocation4 + $0x2b4] sm:$0xf0]  ;;  %v3143_v5 = vor.u32 %v3719_v2, %v3142_v52  ;;  %v829_v10 = vmul.f32 %v828_v34, %v4381_v36  ;;  %v3832_v14 = vld [vmem:[#allocation4 + $0x3a4] sm:$0xf]  ;;  %v3733_v4 = vld [vmem:[#allocation4 + $0x8c] sm:$0xf] }
 0x219   : > { %2537 = vmatpush.bf16.msra.mxu0 %v3207_v49  ;;  %2475 = vmatpush.bf16.msra.mxu3 %v3535_v18  ;;  %v3159_v49 = vor.u32 %v3723_v29, %v3158_v28  ;;  %v1486_v22 = vmul.f32 %v1485_v1, %v4430_v19  ;;  %v3479_v15 = vor.u32 %v3803_v57, %v3478_v60  ;;  %v3240_v19 = vld [vmem:[#allocation4 + $0xd8] sm:$0xf0]  ;;  %v3795_v1 = vld [vmem:[#allocation4 + $0x274] sm:$0xf0]  ;;  %v3430_v60 = vld [vmem:[#allocation4 + $0x248] sm:$0xf] }
 0x21a   : > { %v3130_v17 = vclamps-f32 %v1611_v63, 1.0  ;;  %v4483_v25 = vadd.f32 1.0, %v1497_v47  ;;  %v812_v18 = vmul.f32 %v811_v62, %v4381_v36  ;;  %v4506_v28 = vadd.f32 1.0, %v829_v10  ;;  %v3791_v62 = vld [vmem:[#allocation4 + $0x254] sm:$0xf0] }
 0x21b   : > { %v1487_v43 = vadd.f32 1.1283791, %v1486_v22  ;;  %v1433_v10 = vmul.f32 0.5, %v4416_v24  ;;  %v3725_v29 = vld [vmem:[#allocation4 + $0x4c] sm:$0xf] }
 0x21c   : > { %2490 = vmatmul.bf16.vlgmr.msrb.gmra.mxu0 %v4434_v48  ;;  %v1654_v6 = vadd.f32 1.0, %v3130_v17  ;;  %3894 = vrcp.f32 %v4483_v25  ;;  %vm1504_vm11 = vweird.f32 %v4483_v25  ;;  %v1510_v38 = vand.u32 2147483648, %v4483_v25 }
 0x21d   : > { %2538 = vmatpush.bf16.msra.mxu0 %v3191_v0  ;;  %2476 = vmatpush.bf16.msra.mxu3 %v3519_v42  ;;  %v3600_v0 = vld [vmem:[#allocation4 + $0x3b0] sm:$0xf0]  ;;  %v1508_v47 = vand.u32 2147483647, %v4483_v25  ;;  %v3446_v42 = vld [vmem:[#allocation4 + $0x268] sm:$0xf]  ;;  %v1488_v50 = vmul.f32 %v1487_v43, %v4422_v9  ;;  %3896 = vrcp.f32 %v4506_v28  ;;  %vm836_vm15 = vweird.f32 %v4506_v28 }
 0x21e   : > { %v1656_v46 = vmul.f32 %v1654_v6, %v1570_v12  ;;  %v3603_v16 = vor.u32 %v3832_v14, %v3600_v0  ;;  %v3462_v12 = vld [vmem:[#allocation4 + $0x288] sm:$0xf]  ;;  %v1511_v30 = vor.u32 1.1754944e-38, %v1510_v38  ;;  %v3447_v32 = vor.u32 %v3795_v1, %v3446_v42  ;;  %v3568_v9 = vld [vmem:[#allocation4 + $0x370] sm:$0xf0] }
 0x21f   : > { %vm4515_vm14 = vcmp.eq.f32.partialorder %v1508_v47, 8.507059e+37  ;;  %v3571_v22 = vor.u32 %v3824_v21, %v3568_v9  ;;  %v3382_v0 = vld [vmem:[#allocation4 + $0x1e8] sm:$0xf]  ;;  %v3779_v38 = vld [vmem:[#allocation4 + $0x1f4] sm:$0xf0] }
 0x220   : > { %v4487_v45 = vpack.c.bf16 %v1656_v46, %v1656_v46  ;;  %v3737_v46 = vld [vmem:[#allocation4 + $0xac] sm:$0xf]  ;;  %v3775_v42 = vld [vmem:[#allocation4 + $0x1d4] sm:$0xf0]  ;;  %v3350_v9 = vld [vmem:[#allocation4 + $0x1a8] sm:$0xf] }
 0x221   : > { %2539 = vmatpush.bf16.msra.mxu0 %v3175_v27  ;;  %2521 = vmatpush.bf16.msrb.mxu3 %v3635_v51  ;;  %v3243_v27 = vor.u32 %v3741_v20, %v3240_v19  ;;  %v3227_v58 = vor.u32 %v3737_v46, %v3224_v26  ;;  %v3729_v20 = vld [vmem:[#allocation4 + $0x6c] sm:$0xf]  ;;  %v3431_v19 = vor.u32 %v3791_v62, %v3430_v60  ;;  %v3176_v46 = vld [vmem:[#allocation4 + $0x58] sm:$0xf0]  ;;  %v3816_v26 = vld [vmem:[#allocation4 + $0x324] sm:$0xf] }
 0x222   : > { %2464 = vmatmul.bf16.vlgmr.msra.gmra.mxu2 %v4487_v45  ;;  %v3895_v54 = vpop.eup %3894  ;;  %v3179_v21 = vor.u32 %v3725_v29, %v3176_v46  ;;  %v3480_v29 = vld [vmem:[#allocation4 + $0x2b8] sm:$0xf0] }
 0x223   : > { %2560 = vmatpush.bf16.msra.mxu2 %v3511_v37  ;;  %v1500_v11 = vmul.f32 %v3895_v54, %v4483_v25  ;;  %vm1505_vm12 = vweird.f32 %v3895_v54  ;;  %v3463_v25 = vor.u32 %v3799_v55, %v3462_v12  ;;  %v4539_v43 = vpop.eup %3896  ;;  %v3414_v55 = vld [vmem:[#allocation4 + $0x228] sm:$0xf] }
 0x224   : > { %v1567_v3 = vpop.f32.mrf.mxu3  ;;  %vm4511_vm13 = vmor %vm1504_vm11, %vm1505_vm12  ;;  %vm837_vm1 = vweird.f32 %v4539_v43 }
 0x225   : > { %2540 = vmatpush.bf16.msra.mxu0 %v3159_v49  ;;  %v4494_v63 = vadd.f32 %v1567_v3, %v4336_v53  ;;  %2522 = vmatpush.bf16.msrb.mxu3 %v3619_v61  ;;  %v1501_v17 = vsub.f32 1.0, %v1500_v11  ;;  %v813_v49 = vadd.f32 0.0036580483, %v812_v18  ;;  %vm4572_vm2 = vmor %vm836_vm15, %vm837_vm1 }
 0x227   : > { %v4501_v53 = vmul.f32 %v4494_v63, %v4114_v33  ;;  %2561 = vmatpush.bf16.msra.mxu2 %v3495_v59  ;;  %v1502_v6 = vmul.f32 %v3895_v54, %v1501_v17  ;;  %v3208_v59 = vld [vmem:[#allocation4 + $0x98] sm:$0xf0]  ;;  %v814_v3 = vmul.f32 %v813_v49, %v4381_v36  ;;  %v3820_v17 = vld [vmem:[#allocation4 + $0x344] sm:$0xf]  ;;  %v832_v49 = vmul.f32 %v4539_v43, %v4506_v28 }
 0x229   : > { %2541 = vmatpush.bf16.msra.mxu0 %v3143_v5  ;;  %v1614_v7 = vmul.f32 %v4501_v53, %v4501_v53  ;;  %2523 = vmatpush.bf16.msrb.mxu3 %v3603_v16  ;;  %v1503_v31 = vadd.f32 %v3895_v54, %v1502_v6  ;;  %v4533_v5 = vadd.f32 %v4332_v41, %v4353_v35  ;;  %v3192_v16 = vld [vmem:[#allocation4 + $0x78] sm:$0xf0]  ;;  %v3552_v41 = vld [vmem:[#allocation4 + $0x350] sm:$0xf0]  ;;  %v3787_v6 = vld [vmem:[#allocation4 + $0x234] sm:$0xf0] }
 0x22a   : > { %v3555_v18 = vor.u32 %v3820_v17, %v3552_v41  ;;  %v3195_v8 = vor.u32 %v3729_v20, %v3192_v16  ;;  %v3415_v1 = vor.u32 %v3787_v6, %v3414_v55  ;;  %v3805_v20 = vld [vmem:[#allocation4 + $0x2cc] sm:$0xf]  ;;  %v3144_v41 = vld [vmem:[#allocation4 + $0x18] sm:$0xf0] }
 0x22b   : > { %v4519_v37 = vmin.f32 %v1614_v7, 16.0  ;;  %2562 = vmatpush.bf16.msra.mxu2 %v3479_v15  ;;  %v1507_v51 = vsel %vm4511_vm13, %v3895_v54, %v1503_v31  ;;  %v3211_v15 = vor.u32 %v3733_v4, %v3208_v59  ;;  %v4543_v12 = vmul.f32 %v4533_v5, %v4114_v33  ;;  %v3398_v4 = vld [vmem:[#allocation4 + $0x208] sm:$0xf]  ;;  %v3520_v59 = vld [vmem:[#allocation4 + $0x310] sm:$0xf0] }
 0x22c   : > { %2542 = vmatmul.bf16.vlgmr.msra.gmra.mxu0 %v4434_v48  ;;  %v1512_v39 = vsel %vm4515_vm14, %v1511_v30, %v1507_v51  ;;  %v815_v7 = vadd.f32 0.05243302, %v814_v3  ;;  %v3383_v30 = vor.u32 %v3779_v38, %v3382_v0  ;;  %v3783_v51 = vld [vmem:[#allocation4 + $0x214] sm:$0xf0]  ;;  %v3717_v17 = vld [vmem:[#allocation4 + $0xc] sm:$0xf] }
 0x22d   : > { %2586 = vmatpush.bf16.msrb.mxu0 %v3259_v13  ;;  %v1616_v52 = vmul.f32 2.1237322e-06, %v4519_v37  ;;  %v1627_v2 = vmul.f32 3.8918573e-05, %v4519_v37  ;;  %2524 = vmatpush.bf16.msrb.mxu3 %v3587_v44  ;;  %v1513_v57 = vmul.f32 %v1512_v39, %v1488_v50  ;;  %v3536_v44 = vld [vmem:[#allocation4 + $0x330] sm:$0xf0]  ;;  %v848_v50 = vmul.f32 %v4543_v12, %v4543_v12 }
 0x22e   : > { %v3512_v39 = vld [vmem:[#allocation4 + $0x2f8] sm:$0xf0]  ;;  %v3771_v3 = vld [vmem:[#allocation4 + $0x1b4] sm:$0xf0]  ;;  %v816_v0 = vmul.f32 %v815_v7, %v4381_v36 }
 0x22f   : > { %v1617_v61 = vadd.f32 0.00028619796, %v1616_v52  ;;  %v1628_v54 = vadd.f32 0.001143296, %v1627_v2  ;;  %2563 = vmatpush.bf16.msra.mxu2 %v3463_v25  ;;  %v3127_v11 = vclamps-f32 %v1513_v57, 1.0  ;;  %v3539_v2 = vor.u32 %v3816_v26, %v3536_v44 }
 0x230   : > { %v3366_v25 = vld [vmem:[#allocation4 + $0x1c8] sm:$0xf]  ;;  %v3809_v52 = vld [vmem:[#allocation4 + $0x2ec] sm:$0xf]  ;;  %v3351_v16 = vor.u32 %v3771_v3, %v3350_v9 }
 0x231   : > { %2587 = vmatpush.bf16.msrb.mxu0 %v3243_v27  ;;  %v1618_v13 = vmul.f32 %v1617_v61, %v4519_v37  ;;  %v1629_v14 = vmul.f32 %v1628_v54, %v4519_v37  ;;  %2525 = vmatpush.bf16.msrb.mxu3 %v3571_v22  ;;  %v1517_v35 = vadd.f32 1.0, %v3127_v11  ;;  %v3367_v60 = vor.u32 %v3775_v42, %v3366_v25  ;;  %v3721_v57 = vld [vmem:[#allocation4 + $0x2c] sm:$0xf]  ;;  %v3160_v61 = vld [vmem:[#allocation4 + $0x38] sm:$0xf0] }
 0x232   : > { %2516 = vmatmul.bf16.vlgmr.msrb.gmra.mxu2 %v4487_v45  ;;  %v833_v11 = vsub.f32 1.0, %v832_v49  ;;  %v3318_v44 = vld [vmem:[#allocation4 + $0x168] sm:$0xf]  ;;  %v840_v25 = vand.u32 2147483647, %v4506_v28  ;;  %v1571_v49 = vmul.f32 0.5, %v4494_v63 }
 0x233   : > { %v1619_v47 = vadd.f32 0.0036580483, %v1618_v13  ;;  %v1630_v24 = vadd.f32 0.014752088, %v1629_v14  ;;  %2564 = vmatpush.bf16.msra.mxu2 %v3447_v32  ;;  %v1519_v27 = vmul.f32 %v1517_v35, %v1433_v10  ;;  %v3812_v32 = vld [vmem:[#allocation4 + $0x304] sm:$0xf]  ;;  %v3399_v10 = vor.u32 %v3783_v51, %v3398_v4 }
 0x234   : > { %v3523_v54 = vor.u32 %v3812_v32, %v3520_v59  ;;  %v4555_v13 = vmin.f32 %v848_v50, 16.0  ;;  %v3515_v14 = vor.u32 %v3809_v52, %v3512_v39  ;;  %v834_v55 = vmul.f32 %v4539_v43, %v833_v11  ;;  %v3797_v4 = vld [vmem:[#allocation4 + $0x28c] sm:$0xf]  ;;  %v3464_v51 = vld [vmem:[#allocation4 + $0x298] sm:$0xf0] }
 0x235   : > { %2588 = vmatpush.bf16.msrb.mxu0 %v3227_v58  ;;  %v1631_v23 = vmul.f32 %v1630_v24, %v4519_v37  ;;  %2526 = vmatpush.bf16.msrb.mxu3 %v3555_v18  ;;  %v4546_v31 = vpack.c.bf16 %v1519_v27, %v1519_v27  ;;  %v1620_v34 = vmul.f32 %v1619_v47, %v4519_v37  ;;  %v3334_v24 = vld [vmem:[#allocation4 + $0x188] sm:$0xf]  ;;  %v3767_v18 = vld [vmem:[#allocation4 + $0x194] sm:$0xf0]  ;;  %v817_v27 = vadd.f32 0.18741608, %v816_v0 }
 0x236   : > { %v861_v6 = vmul.f32 3.8918573e-05, %v4555_v13  ;;  %v3335_v46 = vor.u32 %v3767_v18, %v3334_v24  ;;  %v3302_v39 = vld [vmem:[#allocation4 + $0x148] sm:$0xf]  ;;  %vm841_vm3 = vcmp.eq.f32.partialorder %v840_v25, 8.507059e+37  ;;  %v3467_v59 = vor.u32 %v3797_v4, %v3464_v51 }
 0x237   : > { %v1632_v33 = vadd.f32 0.112945676, %v1631_v23  ;;  %2565 = vmatpush.bf16.msra.mxu2 %v3431_v19  ;;  %2451 = vmatmul.bf16.vlgmr.msra.gmra.mxu1 %v4546_v31  ;;  %v1621_v62 = vadd.f32 0.05243302, %v1620_v34  ;;  %v3496_v19 = vld [vmem:[#allocation4 + $0x2d8] sm:$0xf0]  ;;  %v3147_v23 = vor.u32 %v3717_v17, %v3144_v41 }
 0x238   : > { %2547 = vmatpush.bf16.msra.mxu1 %v3383_v30  ;;  %v3499_v7 = vor.u32 %v3805_v20, %v3496_v19  ;;  %v842_v30 = vand.u32 2147483648, %v4506_v28  ;;  %v3763_v34 = vld [vmem:[#allocation4 + $0x174] sm:$0xf0]  ;;  %v862_v50 = vadd.f32 0.001143296, %v861_v6 }
 0x239   : > { %2589 = vmatpush.bf16.msrb.mxu0 %v3211_v15  ;;  %v1633_v58 = vmul.f32 %v1632_v33, %v4519_v37  ;;  %2527 = vmatpush.bf16.msrb.mxu3 %v3539_v2  ;;  %v3163_v15 = vor.u32 %v3721_v57, %v3160_v61  ;;  %v1622_v35 = vmul.f32 %v1621_v62, %v4519_v37  ;;  %v3759_v28 = vld [vmem:[#allocation4 + $0x154] sm:$0xf0]  ;;  %v3793_v57 = vld [vmem:[#allocation4 + $0x26c] sm:$0xf]  ;;  %v3286_v62 = vld [vmem:[#allocation4 + $0x128] sm:$0xf] }
 0x23a   : > { %v835_v33 = vadd.f32 %v4539_v43, %v834_v55  ;;  %v3319_v52 = vor.u32 %v3763_v34, %v3318_v44  ;;  %v863_v9 = vmul.f32 %v862_v50, %v4555_v13  ;;  %v3432_v20 = vld [vmem:[#allocation4 + $0x258] sm:$0xf0]  ;;  %v3751_v24 = vld [vmem:[#allocation4 + $0x114] sm:$0xf0]  ;;  %v3777_v6 = vld [vmem:[#allocation4 + $0x1ec] sm:$0xf] }
 0x23b   : > { %v1634_v22 = vadd.f32 0.4994258, %v1633_v58  ;;  %2566 = vmatpush.bf16.msra.mxu2 %v3415_v1  ;;  %v1623_v26 = vadd.f32 0.18741608, %v1622_v35  ;;  %v818_v1 = vmul.f32 %v817_v27, %v4381_v36  ;;  %v843_v58 = vor.u32 1.1754944e-38, %v842_v30 }
 0x23c   : > { %2548 = vmatpush.bf16.msra.mxu1 %v3367_v60  ;;  %v839_v36 = vsel %vm4572_vm2, %v4539_v43, %v835_v33  ;;  %v3270_v35 = vld [vmem:[#allocation4 + $0x108] sm:$0xf]  ;;  %v3773_v34 = vld [vmem:[#allocation4 + $0x1cc] sm:$0xf]  ;;  %v3368_v33 = vld [vmem:[#allocation4 + $0x1d8] sm:$0xf0] }
 0x23d   : > { %2590 = vmatpush.bf16.msrb.mxu0 %v3195_v8  ;;  %v1635_v38 = vmul.f32 %v1634_v22, %v4519_v37  ;;  %2528 = vmatpush.bf16.msrb.mxu3 %v3523_v54  ;;  %v3801_v8 = vld [vmem:[#allocation4 + $0x2ac] sm:$0xf]  ;;  %v819_v60 = vadd.f32 1.1283791, %v818_v1  ;;  %v3303_v54 = vor.u32 %v3759_v28, %v3302_v39  ;;  %v844_v22 = vsel %vm841_vm3, %v843_v58, %v839_v36  ;;  %v3400_v1 = vld [vmem:[#allocation4 + $0x218] sm:$0xf0] }
 0x23e   : > { %v3483_v42 = vor.u32 %v3801_v8, %v3480_v29  ;;  %v3785_v8 = vld [vmem:[#allocation4 + $0x22c] sm:$0xf]  ;;  %v3271_v30 = vor.u32 %v3751_v24, %v3270_v35  ;;  %v3638_v4 = vld [vmem:[#allocation4 + $0x3e8] sm:$0xf]  ;;  %v3843_v51 = vld [vmem:[#allocation4 + $0x3f4] sm:$0xf0] }
 0x23f   : > { %v4560_v47 = vadd.f32 1.0, %v1635_v38  ;;  %2567 = vmatpush.bf16.msra.mxu2 %v3399_v10  ;;  %v3755_v10 = vld [vmem:[#allocation4 + $0x134] sm:$0xf0]  ;;  %v820_v0 = vmul.f32 %v819_v60, %v4365_v40  ;;  %v864_v38 = vadd.f32 0.014752088, %v863_v9  ;;  %v804_v36 = vmul.f32 0.5, %v4359_v56 }
 0x240   : > { %2549 = vmatpush.bf16.msra.mxu1 %v3351_v16  ;;  %v3287_v16 = vor.u32 %v3755_v10, %v3286_v62  ;;  %v3352_v39 = vld [vmem:[#allocation4 + $0x1b8] sm:$0xf0]  ;;  %v3622_v60 = vld [vmem:[#allocation4 + $0x3c8] sm:$0xf]  ;;  %v3839_v9 = vld [vmem:[#allocation4 + $0x3d4] sm:$0xf0] }
 0x241   : > { %2591 = vmatpush.bf16.msrb.mxu0 %v3179_v21  ;;  %3898 = vrcp.f32 %v4560_v47  ;;  %v1624_v21 = vmul.f32 %v1623_v26, %v4519_v37  ;;  %v3448_v37 = vld [vmem:[#allocation4 + $0x278] sm:$0xf0]  ;;  %v1648_v3 = vand.u32 2147483648, %v4560_v47  ;;  %vm1642_vm5 = vweird.f32 %v4560_v47 }
 0x242   : > { %2568 = vmatmul.bf16.vlgmr.msra.gmra.mxu2 %v4487_v45  ;;  %v845_v17 = vmul.f32 %v844_v22, %v820_v0  ;;  %v865_v27 = vmul.f32 %v864_v38, %v4555_v13  ;;  %v850_v62 = vmul.f32 2.1237322e-06, %v4555_v13  ;;  %v3623_v56 = vor.u32 %v3839_v9, %v3622_v60  ;;  %v3833_v9 = vld [vmem:[#allocation4 + $0x3ac] sm:$0xf] }
 0x243   : > { %2612 = vmatpush.bf16.msrb.mxu2 %v3515_v14  ;;  %v1625_v43 = vadd.f32 1.1283791, %v1624_v21  ;;  %v3451_v14 = vor.u32 %v3793_v57, %v3448_v37  ;;  %v1649_v41 = vor.u32 1.1754944e-38, %v1648_v3  ;;  %v3769_v21 = vld [vmem:[#allocation4 + $0x1ac] sm:$0xf] }
 0x244   : > { %2550 = vmatpush.bf16.msra.mxu1 %v3335_v46  ;;  %v2866_v46 = vclamps-f32 %v845_v17, 1.0  ;;  %v866_v25 = vadd.f32 0.112945676, %v865_v27  ;;  %v3355_v37 = vor.u32 %v3769_v21, %v3352_v39  ;;  %v3835_v3 = vld [vmem:[#allocation4 + $0x3b4] sm:$0xf0] }
 0x245   : > { %2592 = vmatpush.bf16.msrb.mxu0 %v3163_v15  ;;  %v3789_v15 = vld [vmem:[#allocation4 + $0x24c] sm:$0xf]  ;;  %v1626_v18 = vmul.f32 %v1625_v43, %v4501_v53  ;;  %v3606_v43 = vld [vmem:[#allocation4 + $0x3a8] sm:$0xf]  ;;  %v851_v0 = vadd.f32 0.00028619796, %v850_v62 }
 0x246   : > { %v3435_v40 = vor.u32 %v3789_v15, %v3432_v20  ;;  %v3590_v15 = vld [vmem:[#allocation4 + $0x388] sm:$0xf]  ;;  %v3831_v20 = vld [vmem:[#allocation4 + $0x394] sm:$0xf0]  ;;  %v3304_v17 = vld [vmem:[#allocation4 + $0x158] sm:$0xf0] }
 0x247   : > { %2613 = vmatpush.bf16.msrb.mxu2 %v3499_v7  ;;  %v3899_v2 = vpop.eup %3898  ;;  %2503 = vmatmul.bf16.vlgmr.msrb.gmra.mxu1 %v4546_v31  ;;  %v3384_v7 = vld [vmem:[#allocation4 + $0x1f8] sm:$0xf0]  ;;  %v852_v35 = vmul.f32 %v851_v0, %v4555_v13  ;;  %v3837_v39 = vld [vmem:[#allocation4 + $0x3cc] sm:$0xf] }
 0x248   : > { %v1638_v32 = vmul.f32 %v3899_v2, %v4560_v47  ;;  %2551 = vmatpush.bf16.msra.mxu1 %v3319_v52  ;;  %vm1643_vm4 = vweird.f32 %v3899_v2  ;;  %v3387_v26 = vor.u32 %v3777_v6, %v3384_v7  ;;  %v888_v52 = vadd.f32 1.0, %v2866_v46  ;;  %v3753_v6 = vld [vmem:[#allocation4 + $0x12c] sm:$0xf]  ;;  %v3288_v7 = vld [vmem:[#allocation4 + $0x138] sm:$0xf0] }
 0x249   : > { %2593 = vmatpush.bf16.msrb.mxu0 %v3147_v23  ;;  %vm1644_vm6 = vmor %vm1642_vm5, %vm1643_vm4  ;;  %v853_v27 = vadd.f32 0.0036580483, %v852_v35  ;;  %v3544_v35 = vld [vmem:[#allocation4 + $0x338] sm:$0xf0] }
 0x24a   : > { %v1639_v61 = vsub.f32 1.0, %v1638_v32  ;;  %v3639_v32 = vor.u32 %v3843_v51, %v3638_v4  ;;  %v890_v57 = vmul.f32 %v888_v52, %v804_v36  ;;  %v3841_v4 = vld [vmem:[#allocation4 + $0x3ec] sm:$0xf]  ;;  %v3640_v51 = vld [vmem:[#allocation4 + $0x3f8] sm:$0xf0]  ;;  %v2756_v36 = vld [vmem:[%s4649_s11] sm:$0xff] }
 0x24b   : > { %2614 = vmatpush.bf16.msrb.mxu2 %v3483_v42  ;;  %v3781_v42 = vld [vmem:[#allocation4 + $0x20c] sm:$0xf]  ;;  %2759 = vperm.xlu2 %3879, %v2756_v36  }
 0x24c   : > { %2594 = vmatmul.bf16.vlgmr.msrb.gmra.mxu0 %v4434_v48  ;;  %v1640_v11 = vmul.f32 %v3899_v2, %v1639_v61  ;;  %v1646_v48 = vand.u32 2147483647, %v4560_v47  ;;  %2552 = vmatpush.bf16.msra.mxu1 %v3303_v54  ;;  %v3416_v47 = vld [vmem:[#allocation4 + $0x238] sm:$0xf0]  ;;  %v3403_v28 = vor.u32 %v3781_v42, %v3400_v1  ;;  %v3765_v61 = vld [vmem:[#allocation4 + $0x18c] sm:$0xf] }
 0x24d   : > { %v3419_v53 = vor.u32 %v3785_v8, %v3416_v47  ;;  %v3336_v54 = vld [vmem:[#allocation4 + $0x198] sm:$0xf0]  ;;  %v3823_v8 = vld [vmem:[#allocation4 + $0x354] sm:$0xf0]  ;;  %v3291_v47 = vor.u32 %v3753_v6, %v3288_v7  ;;  %v3526_v1 = vld [vmem:[#allocation4 + $0x308] sm:$0xf] }
 0x24e   : > { %v1641_v19 = vadd.f32 %v3899_v2, %v1640_v11  ;;  %vm1647_vm7 = vcmp.eq.f32.partialorder %v1646_v48, 8.507059e+37  ;;  %v3339_v10 = vor.u32 %v3765_v61, %v3336_v54  ;;  %v3761_v11 = vld [vmem:[#allocation4 + $0x16c] sm:$0xf]  ;;  %v3320_v48 = vld [vmem:[#allocation4 + $0x178] sm:$0xf0] }
 0x24f   : > { %2615 = vmatpush.bf16.msrb.mxu2 %v3467_v59  ;;  %v867_v59 = vmul.f32 %v866_v25, %v4555_v13 }
 0x250   : > { %v1645_v55 = vsel %vm1644_vm6, %v3899_v2, %v1641_v19  ;;  %2553 = vmatpush.bf16.msra.mxu1 %v3287_v16  ;;  %v3371_v2 = vor.u32 %v3773_v34, %v3368_v33  ;;  %v3323_v19 = vor.u32 %v3761_v11, %v3320_v48  ;;  %v3757_v16 = vld [vmem:[#allocation4 + $0x14c] sm:$0xf]  ;;  %v3819_v34 = vld [vmem:[#allocation4 + $0x334] sm:$0xf0] }
 0x251   : > { %v1650_v23 = vsel %vm1647_vm7, %v1649_v41, %v1645_v55  ;;  %v868_v22 = vadd.f32 0.4994258, %v867_v59  ;;  %v3591_v41 = vor.u32 %v3831_v20, %v3590_v15  ;;  %v3307_v55 = vor.u32 %v3757_v16, %v3304_v17  ;;  %v3825_v48 = vld [vmem:[#allocation4 + $0x36c] sm:$0xf]  ;;  %v3560_v20 = vld [vmem:[#allocation4 + $0x358] sm:$0xf0] }
 0x252   : > { %v1651_v29 = vmul.f32 %v1650_v23, %v1626_v18  ;;  %v3827_v18 = vld [vmem:[#allocation4 + $0x374] sm:$0xf0]  ;;  %v3558_v23 = vld [vmem:[#allocation4 + $0x348] sm:$0xf]  ;;  %v3821_v15 = vld [vmem:[#allocation4 + $0x34c] sm:$0xf] }
 0x253   : > { %2616 = vmatpush.bf16.msrb.mxu2 %v3451_v14  ;;  %v3607_v14 = vor.u32 %v3835_v3, %v3606_v43  ;;  %v869_v38 = vmul.f32 %v868_v22, %v4555_v13  ;;  %v3559_v46 = vor.u32 %v3823_v8, %v3558_v23  ;;  %v3592_v22 = vld [vmem:[#allocation4 + $0x398] sm:$0xf0]  ;;  %v3563_v17 = vor.u32 %v3821_v15, %v3560_v20 }
 0x254   : > { %v3131_v44 = vclamps-f32 %v1651_v29, 1.0  ;;  %2554 = vmatpush.bf16.msra.mxu1 %v3271_v30  ;;  %v3749_v29 = vld [vmem:[#allocation4 + $0x10c] sm:$0xf]  ;;  %v3272_v30 = vld [vmem:[#allocation4 + $0x118] sm:$0xf0] }
 0x255   : > { %v4601_v24 = vadd.f32 1.0, %v869_v38  ;;  %v3275_v33 = vor.u32 %v3749_v29, %v3272_v30 }
 0x256   : > { %v1655_v50 = vadd.f32 1.0, %v3131_v44  ;;  %v3542_v44 = vld [vmem:[#allocation4 + $0x328] sm:$0xf] }
 0x257   : > { %2617 = vmatpush.bf16.msrb.mxu2 %v3435_v40  ;;  %2555 = vmatmul.bf16.vlgmr.msra.gmra.mxu1 %v4546_v31  ;;  %3900 = vrcp.f32 %v4601_v24  ;;  %v3543_v25 = vor.u32 %v3819_v34, %v3542_v44  ;;  %vm876_vm8 = vweird.f32 %v4601_v24  ;;  %v880_v62 = vand.u32 2147483647, %v4601_v24 }
 0x258   : > { %2599 = vmatpush.bf16.msrb.mxu1 %v3387_v26  ;;  %v1657_v58 = vmul.f32 %v1655_v50, %v1571_v49  ;;  %v854_v26 = vmul.f32 %v853_v27, %v4555_v13  ;;  %v3815_v49 = vld [vmem:[#allocation4 + $0x314] sm:$0xf0]  ;;  %v805_v27 = vmul.f32 0.5, %v4533_v5 }
 0x259   : > { %v3527_v52 = vor.u32 %v3815_v49, %v3526_v1  ;;  %vm881_vm11 = vcmp.eq.f32.partialorder %v880_v62, 8.507059e+37 }
 0x25a   : > { %v4594_v63 = vpack.c.bf16 %v1657_v58, %v1657_v58  ;;  %v855_v42 = vadd.f32 0.05243302, %v854_v26  ;;  %v3643_v58 = vor.u32 %v3841_v4, %v3640_v51 }
 0x25b   : > { %2618 = vmatpush.bf16.msrb.mxu2 %v3419_v53 }
 0x25c   : > { %2600 = vmatpush.bf16.msrb.mxu1 %v3371_v2  ;;  %2477 = vmatmul.bf16.vlgmr.msra.gmra.mxu3 %v4594_v63  ;;  %v856_v2 = vmul.f32 %v855_v42, %v4555_v13 }
 0x25d   : > { %2573 = vmatpush.bf16.msra.mxu3 %v3639_v32  ;;  %v3901_v53 = vpop.eup %3900 }
 0x25e   : > { %v872_v50 = vmul.f32 %v3901_v53, %v4601_v24  ;;  %v857_v32 = vadd.f32 0.18741608, %v856_v2  ;;  %vm877_vm9 = vweird.f32 %v3901_v53 }
 0x25f   : > { %2619 = vmatpush.bf16.msrb.mxu2 %v3403_v28  ;;  %v3624_v28 = vld [vmem:[#allocation4 + $0x3d8] sm:$0xf0]  ;;  %vm878_vm10 = vmor %vm876_vm8, %vm877_vm9 }
 0x260   : > { %2601 = vmatpush.bf16.msrb.mxu1 %v3355_v37  ;;  %v873_v21 = vsub.f32 1.0, %v872_v50  ;;  %v3627_v59 = vor.u32 %v3837_v39, %v3624_v28  ;;  %v882_v37 = vand.u32 2147483648, %v4601_v24  ;;  %v2668_v28 = vld [vmem:[%s4647_s9] sm:$0xff] }
 0x261   : > { %2574 = vmatpush.bf16.msra.mxu3 %v3623_v56  ;;  %v3829_v56 = vld [vmem:[#allocation4 + $0x38c] sm:$0xf] }
 0x262   : > { %2620 = vmatmul.bf16.vlgmr.msrb.gmra.mxu2 %v4487_v45  ;;  %v3574_v45 = vld [vmem:[#allocation4 + $0x368] sm:$0xf]  ;;  %v874_v60 = vmul.f32 %v3901_v53, %v873_v21  ;;  %v883_v3 = vor.u32 1.1754944e-38, %v882_v37 }
 0x263   : > { %2731 = vmatpush.msra.mxu2 %v890_v57  ;;  %v3575_v40 = vor.u32 %v3827_v18, %v3574_v45  ;;  %v3608_v57 = vld [vmem:[#allocation4 + $0x3b8] sm:$0xf0]  ;;  %v3813_v18 = vld [vmem:[#allocation4 + $0x30c] sm:$0xf] }
 0x264   : > { %2602 = vmatpush.bf16.msrb.mxu1 %v3339_v10  ;;  %v3611_v61 = vor.u32 %v3833_v9, %v3608_v57  ;;  %v875_v54 = vadd.f32 %v3901_v53, %v874_v60  ;;  %v3595_v10 = vor.u32 %v3829_v56, %v3592_v22 }
 0x265   : > { %2575 = vmatpush.bf16.msra.mxu3 %v3607_v14  ;;  %v3576_v14 = vld [vmem:[#allocation4 + $0x378] sm:$0xf0] }
 0x266   : > { %v879_v11 = vsel %vm878_vm10, %v3901_v53, %v875_v54 }
 0x267   : > { %v884_v0 = vsel %vm881_vm11, %v883_v3, %v879_v11 }
 0x268   : > { %2603 = vmatpush.bf16.msrb.mxu1 %v3323_v19 }
 0x269   : > { %2576 = vmatpush.bf16.msra.mxu3 %v3591_v41  ;;  %v3817_v41 = vld [vmem:[#allocation4 + $0x32c] sm:$0xf] }
 0x26a   : > { %v3547_v45 = vor.u32 %v3817_v41, %v3544_v35 }
 0x26c   : > { %2604 = vmatpush.bf16.msrb.mxu1 %v3307_v55  ;;  %2529 = vmatmul.bf16.vlgmr.msrb.gmra.mxu3 %v4594_v63  ;;  %v3528_v55 = vld [vmem:[#allocation4 + $0x318] sm:$0xf0] }
 0x26d   : > { %2577 = vmatpush.bf16.msra.mxu3 %v3575_v40  ;;  %v3531_v40 = vor.u32 %v3813_v18, %v3528_v55 }
 0x270   : > { %2605 = vmatpush.bf16.msrb.mxu1 %v3291_v47 }
 0x271   : > { %2578 = vmatpush.bf16.msra.mxu3 %v3559_v46 }
 0x272   : > { %3646 = vmatmul.msk.f32.vlgmr.msra.gmra.mxu2 %vm518_vm0, %v2668_v28 }
 0x274   : > { %2606 = vmatpush.bf16.msrb.mxu1 %v3275_v33 }
 0x275   : > { %2579 = vmatpush.bf16.msra.mxu3 %v3543_v25 }
 0x277   : > { %2607 = vmatmul.bf16.vlgmr.msrb.gmra.mxu1 %v4546_v31  ;;  %v858_v31 = vmul.f32 %v857_v32, %v4555_v13  ;;  %v3579_v13 = vor.u32 %v3825_v48, %v3576_v14 }
 0x279   : > { %2580 = vmatpush.bf16.msra.mxu3 %v3527_v52  ;;  %v859_v43 = vadd.f32 1.1283791, %v858_v31 }
 0x27b   : > { %v860_v38 = vmul.f32 %v859_v43, %v4543_v12 }
 0x27c   : > { %2581 = vmatmul.bf16.vlgmr.msra.gmra.mxu3 %v4594_v63 }
 0x27d   : > { %2625 = vmatpush.bf16.msrb.mxu3 %v3643_v58  ;;  %v885_v16 = vmul.f32 %v884_v0, %v860_v38 }
 0x27f   : > { %v2867_v24 = vclamps-f32 %v885_v16, 1.0 }
 0x281   : > { %2626 = vmatpush.bf16.msrb.mxu3 %v3627_v59  ;;  %v889_v7 = vadd.f32 1.0, %v2867_v24 }
 0x283   : > { %v891_v12 = vmul.f32 %v889_v7, %v805_v27 }
 0x285   : > { %2627 = vmatpush.bf16.msrb.mxu3 %v3611_v61 }
 0x289   : > { %2628 = vmatpush.bf16.msrb.mxu3 %v3595_v10  ;;  %v2439_v19 = vpop.f32.mrf.mxu0 }
 0x28d   : > { %2629 = vmatpush.bf16.msrb.mxu3 %v3579_v13 }
 0x291   : > { %2630 = vmatpush.bf16.msrb.mxu3 %v3563_v17  ;;  %v2441_v6 = vpop.f32.mrf.mxu0 }
 0x295   : > { %2631 = vmatpush.bf16.msrb.mxu3 %v3547_v45 }
 0x299   : > { %2632 = vmatpush.bf16.msrb.mxu3 %v3531_v40  ;;  %v2491_v23 = vpop.f32.mrf.mxu0 }
 0x29c   : > { %2633 = vmatmul.bf16.vlgmr.msrb.gmra.mxu3 %v4594_v63 }
 0x29d   : > { %2751 = vmatpush.msra.mxu3 %v891_v12 }
 0x2a1   : > { %v2493_v8 = vpop.f32.mrf.mxu0 }
 0x2a5   : > { %v2465_v47 = vpop.f32.mrf.mxu2 }
 0x2a9   : > { %v2543_v29 = vpop.f32.mrf.mxu0 }
 0x2ac   : > { %3647 = vmatmul.msk.f32.vlgmr.msra.gmra.mxu3 %vm518_vm0, %v2668_v28 }
 0x2ad   : > { %v2467_v30 = vpop.f32.mrf.mxu2 }
 0x2b1   : > { %v2545_v46 = vpop.f32.mrf.mxu0 }
 0x2b4   : > { %v2452_v44 = vpop.f32.mrf.mxu1 }
 0x2b5   : > { %v2517_v26 = vpop.f32.mrf.mxu2  ;;  %v2453_v34 = vadd.f32 %v2452_v44, %v2439_v19  ;;  %v2669_v19 = vld [vmem:[%s4648_s10] sm:$0xff] }
 0x2b7   : > { %v2466_v33 = vadd.f32 %v2465_v47, %v2453_v34 }
 0x2bc   : > { %v2454_v25 = vpop.f32.mrf.mxu1 }
 0x2bd   : > { %v2519_v53 = vpop.f32.mrf.mxu2 }
 0x2c4   : > { %v2504_v5 = vpop.f32.mrf.mxu1 }
 0x2c5   : > { %v2569_v42 = vpop.f32.mrf.mxu2  ;;  %v2505_v49 = vadd.f32 %v2504_v5, %v2491_v23 }
 0x2c7   : > { %v2518_v50 = vadd.f32 %v2517_v26, %v2505_v49 }
 0x2c9   : > { %v2595_v1 = vpop.f32.mrf.mxu0 }
 0x2cc   : > { %v2506_v52 = vpop.f32.mrf.mxu1 }
 0x2cd   : > { %v2571_v4 = vpop.f32.mrf.mxu2 }
 0x2d1   : > { %v2597_v51 = vpop.f32.mrf.mxu0 }
 0x2d4   : > { %v2556_v63 = vpop.f32.mrf.mxu1 }
 0x2d5   : > { %v2557_v9 = vadd.f32 %v2556_v63, %v2543_v29 }
 0x2d7   : > { %v2570_v31 = vadd.f32 %v2569_v42, %v2557_v9 }
 0x2dc   : > { %v2558_v2 = vpop.f32.mrf.mxu1 }
 0x2df   : > { %v2478_v58 = vpop.f32.mrf.mxu3 }
 0x2e0   : > { %v2479_v37 = vadd.f32 %v2478_v58, %v2466_v33  ;;  %v2760_v33 = vpop.permute.xlu2 %2759 }
 0x2e2   : > { %v2638_v62 = vmul.f32 %v2479_v37, %v2479_v37 }
 0x2e5   : > { %v2621_v21 = vpop.f32.mrf.mxu2 }
 0x2e7   : > { %v2480_v39 = vpop.f32.mrf.mxu3 }
 0x2ed   : > { %v2623_v36 = vpop.f32.mrf.mxu2 }
 0x2ef   : > { %v2530_v32 = vpop.f32.mrf.mxu3 }
 0x2f0   : > { %v2531_v17 = vadd.f32 %v2530_v32, %v2518_v50 }
 0x2f2   : > { %v2639_v45 = vmul.f32 %v2531_v17, %v2531_v17 }
 0x2f4   : > { %v2608_v59 = vpop.f32.mrf.mxu1 }
 0x2f5   : > { %v2609_v13 = vadd.f32 %v2608_v59, %v2595_v1  ;;  %v2733_v26 = vpop.f32.mrf.mxu2 }
 0x2f7   : > { %v2532_v60 = vpop.f32.mrf.mxu3  ;;  %v2622_v41 = vadd.f32 %v2621_v21, %v2609_v13 }
 0x2fc   : > { %v2610_v57 = vpop.f32.mrf.mxu1 }
 0x2ff   : > { %v2582_v61 = vpop.f32.mrf.mxu3 }
 0x300   : > { %v2583_v54 = vadd.f32 %v2582_v61, %v2570_v31 }
 0x302   : > { %v2640_v56 = vmul.f32 %v2583_v54, %v2583_v54 }
 0x304   : > { %v2642_v22 = vadd.f32 %v2640_v56, %v2638_v62 }
 0x306   : > { %3902 = vrsqrt.f32 %v2642_v22  ;;  %vm2651_vm12 = vcmp.eq.f32.partialorder %v2642_v22, inf  ;;  %v2654_v15 = vand.u32 2147483648, %v2642_v22  ;;  %vm2653_vm13 = vcmp.eq.f32.partialorder %v2642_v22, 0.0 }
 0x307   : > { %v2584_v43 = vpop.f32.mrf.mxu3 }
 0x30c   : > { %v3903_v3 = vpop.eup %3902 }
 0x30d   : > { %v2645_v10 = vmul.f32 %v3903_v3, %v2642_v22 }
 0x30f   : > { %v2646_v11 = vmul.f32 %v3903_v3, %v2645_v10 }
 0x311   : > { %v2647_v48 = vmul.f32 0.5, %v2646_v11 }
 0x313   : > { %v2648_v14 = vsub.f32 1.5, %v2647_v48 }
 0x315   : > { %v2649_v0 = vmul.f32 %v3903_v3, %v2648_v14 }
 0x317   : > { %v2650_v38 = vmul.f32 %v2649_v0, %v2642_v22 }
 0x319   : > { %v2652_v20 = vsel %vm2651_vm12, %v2642_v22, %v2650_v38 }
 0x31a   : > { %v2655_v16 = vsel %vm2653_vm13, %v2654_v15, %v2652_v20 }
 0x31b   : > { %2688 = vmatpush.msra.mxu0 %v2655_v16 }
 0x31c   : > { %3644 = vmatmul.msk.f32.vlgmr.msra.gmra.mxu0 %vm518_vm0, %v2669_v19 }
 0x31f   : > { %v2634_v35 = vpop.f32.mrf.mxu3 }
 0x320   : > { %v2635_v24 = vadd.f32 %v2634_v35, %v2622_v41 }
 0x322   : > { %v2641_v18 = vmul.f32 %v2635_v24, %v2635_v24 }
 0x324   : > { %v2643_v55 = vadd.f32 %v2641_v18, %v2639_v45 }
 0x326   : > { %3904 = vrsqrt.f32 %v2643_v55  ;;  %vm2663_vm14 = vcmp.eq.f32.partialorder %v2643_v55, inf  ;;  %v2666_v29 = vand.u32 2147483648, %v2643_v55  ;;  %vm2665_vm15 = vcmp.eq.f32.partialorder %v2643_v55, 0.0 }
 0x327   : > { %v2636_v6 = vpop.f32.mrf.mxu3 }
 0x32c   : > { %v3905_v7 = vpop.eup %3904 }
 0x32d   : > { %v2657_v40 = vmul.f32 %v3905_v7, %v2643_v55 }
 0x32f   : > { %v2658_v27 = vmul.f32 %v3905_v7, %v2657_v40  ;;  %v2753_v25 = vpop.f32.mrf.mxu3 }
 0x331   : > { %v2659_v12 = vmul.f32 0.5, %v2658_v27 }
 0x333   : > { %v2660_v23 = vsub.f32 1.5, %v2659_v12 }
 0x335   : > { %v2661_v8 = vmul.f32 %v3905_v7, %v2660_v23 }
 0x337   : > { %v2662_v47 = vmul.f32 %v2661_v8, %v2643_v55 }
 0x339   : > { %v2664_v30 = vsel %vm2663_vm14, %v2643_v55, %v2662_v47 }
 0x33a   : > { %v2667_v46 = vsel %vm2665_vm15, %v2666_v29, %v2664_v30 }
 0x33b   : > { %2708 = vmatpush.msra.mxu1 %v2667_v46 }
 0x33c   : > { %3645 = vmatmul.msk.f32.vlgmr.msra.gmra.mxu1 %vm518_vm0, %v2669_v19 }
 0x399   : > { %v2690_v44 = vpop.f32.mrf.mxu0 }
 0x39a   : > { %v2734_v34 = vadd.f32 %v2733_v26, %v2690_v44 }
 0x39c   : > { %v2762_v53 = vadd.f32 %v2760_v33, %v2734_v34 }
 0x39e   : > { %2764 = vst [vmem:[%s501_s20] sm:$0xff] %v2762_v53 }
 0x3b9   : > { %v2710_v42 = vpop.f32.mrf.mxu1 }
 0x3ba   : > { %v2754_v1 = vadd.f32 %v2753_v25, %v2710_v42 }
 0x3bc   : > { %v2763_v5 = vadd.f32 %v2760_v33, %v2754_v1 }
 0x3be   : > { %2765 = vst [vmem:[%s501_s20 + $0x8] sm:$0xff] %v2763_v5 }
 0x3bf PF: > { %s26_s29 = sadd.s32 1, %s3980_s29  }
 0x3c0   : > { %p23_p7 = scmp.ge.s32.totalorder %s26_s29, 4  }
 0x3c2   :  { %25 = sbr.rel (!%p23_p7) target bundleno = 2 (0x2), region = 115 }
 0x3c7   :  { %2787 = vsyncpa [#allocation3], 1 }
 0x3c8   :  { %2789 = vsyncpa [#allocation3 + $0x1], 1 }
 0x3c9   :  { %2790 = vsyncpa [#allocation5], 1 }

</bundles_post_ra>
